<compile_context>
chip_gen: v7x
topology: tpu7x:2x2x1
jax: 0.10.0
libtpu: 0.0.40
codegen_flags: <defaults>
</compile_context>

<pallas_src>
import functools

import jax
import jax.numpy as jnp
from jax.experimental import pallas as pl
from jax.experimental.pallas import tpu as pltpu

N_TEXT = 35    # text positions (hard-coded by the module's .repeat(1, 35, 1, 1))
N_IMG = 49     # image regions (hard-coded by the module's .repeat(1, 1, 49, 1))
D_MODEL = 200  # feature dim


def _round_up(x, m):
    return (x + m - 1) // m * m


# ----------------------------- Pallas kernel -----------------------------

def _co_attention_kernel(text_ref, img_ref,
                         wt1_ref, bt1_ref, wi1_ref, w1a_ref, w1b_ref, b1_ref,
                         wt2_ref, wi2_ref, bi2_ref, w2a_ref, w2b_ref, b2_ref,
                         att_text_ref, att_img_ref,
                         *, n_text, n_img):
    f32 = jnp.float32
    text = text_ref[0]                       # (T_pad, D_pad)
    img = img_ref[0]                         # (I_pad, D_pad)
    T_pad, D_pad = text.shape
    I_pad = img.shape[0]

    # contract over the feature (lane) dim of both operands: q.k^T pattern
    dim_ll = (((1,), (1,)), ((), ()))

    # ------------- stage 1: attention over the 49 image regions -------------
    # a = tanh(text_Linear_1(text)),  bm = tanh(img_Linear_1(img))
    a = jnp.tanh(jnp.dot(text, wt1_ref[...], preferred_element_type=f32) + bt1_ref[...])
    bm = jnp.tanh(jnp.dot(img, wi1_ref[...], preferred_element_type=f32))

    # Linear_1(tanh(cat(a, bm))) = a.w1a + bm.w1b + b1   (rank-1 decomposition)
    w1a_mat = jnp.broadcast_to(w1a_ref[...], (I_pad, D_pad))
    w1b_mat = jnp.broadcast_to(w1b_ref[...], (T_pad, D_pad))
    u = jax.lax.dot_general(a, w1a_mat, dim_ll, preferred_element_type=f32)   # u[i,j] = a_i.w1a
    v = jax.lax.dot_general(w1b_mat, bm, dim_ll, preferred_element_type=f32)  # v[i,j] = bm_j.w1b
    logits1 = u + v + b1_ref[...]                                             # (T_pad, I_pad)

    col1 = jax.lax.broadcasted_iota(jnp.int32, (T_pad, I_pad), 1)
    logits1 = jnp.where(col1 < n_img, logits1, -1e30)                         # mask padded regions
    m1 = jnp.max(logits1, axis=-1, keepdims=True)
    e1 = jnp.exp(logits1 - m1)
    att1 = e1 / jnp.sum(e1, axis=-1, keepdims=True)                           # softmax over image regions
    att_img = jnp.dot(att1, img, preferred_element_type=f32)                  # (T_pad, D_pad)
    att_img_ref[0] = att_img

    # ------------- stage 2: attention over the 35 text positions -------------
    # cat order in torch is (img part, text part):
    #   score2[i, j] = tanh(I2(att_img_i)).w2[:200] + tanh(T2(text_j)).w2[200:] + b2
    c = jnp.tanh(jnp.dot(att_img, wi2_ref[...], preferred_element_type=f32) + bi2_ref[...])
    d = jnp.tanh(jnp.dot(text, wt2_ref[...], preferred_element_type=f32))

    w2a_mat = jnp.broadcast_to(w2a_ref[...], (T_pad, D_pad))
    w2b_mat = jnp.broadcast_to(w2b_ref[...], (T_pad, D_pad))
    p_sc = jax.lax.dot_general(c, w2a_mat, dim_ll, preferred_element_type=f32)
    q_sc = jax.lax.dot_general(w2b_mat, d, dim_ll, preferred_element_type=f32)
    logits2 = p_sc + q_sc + b2_ref[...]                                       # (T_pad, T_pad)

    col2 = jax.lax.broadcasted_iota(jnp.int32, (T_pad, T_pad), 1)
    logits2 = jnp.where(col2 < n_text, logits2, -1e30)
    m2 = jnp.max(logits2, axis=-1, keepdims=True)
    e2 = jnp.exp(logits2 - m2)
    att2 = e2 / jnp.sum(e2, axis=-1, keepdims=True)                           # softmax over text positions
    att_text_ref[0] = jnp.dot(att2, text, preferred_element_type=f32)


# ----------------------------- wrapper -----------------------------

def co_attention_pallas(text_embedding, img_embedding, params):
    f32 = jnp.float32
    text = text_embedding.astype(f32)
    img = img_embedding.astype(f32)
    B, T, D = text.shape
    I = img.shape[1]

    T_pad = _round_up(T, 8)
    I_pad = _round_up(I, 8)
    D_pad = _round_up(D, 128)

    text_p = jnp.pad(text, ((0, 0), (0, T_pad - T), (0, D_pad - D)))
    img_p = jnp.pad(img, ((0, 0), (0, I_pad - I), (0, D_pad - D)))

    def pad_mat(w):   # torch (out, in) -> (in, out), zero-padded to (D_pad, D_pad)
        w = w.astype(f32).T
        return jnp.pad(w, ((0, D_pad - w.shape[0]), (0, D_pad - w.shape[1])))

    def pad_vec(v):   # (D,) -> (1, D_pad)
        v = v.astype(f32)
        return jnp.pad(v, (0, D_pad - v.shape[0])).reshape(1, D_pad)

    wt1 = pad_mat(params['w_t1'])
    bt1 = pad_vec(params['b_t1'])
    wi1 = pad_mat(params['w_i1'])
    w1a = pad_vec(params['w_1'][0, :D])          # text half of Linear_1
    w1b = pad_vec(params['w_1'][0, D:])          # image half of Linear_1
    b1 = params['b_1'].astype(f32).reshape(1, 1)
    wt2 = pad_mat(params['w_t2'])
    wi2 = pad_mat(params['w_i2'])
    bi2 = pad_vec(params['b_i2'])
    w2a = pad_vec(params['w_2'][0, :D])          # image half of Linear_2 (cat puts img first)
    w2b = pad_vec(params['w_2'][0, D:])          # text half of Linear_2
    b2 = params['b_2'].astype(f32).reshape(1, 1)

    kernel = functools.partial(_co_attention_kernel, n_text=T, n_img=I)

    def batched(rows):
        return pl.BlockSpec((1, rows, D_pad), lambda b: (b, 0, 0))

    w_spec = pl.BlockSpec((D_pad, D_pad), lambda b: (0, 0))
    row_spec = pl.BlockSpec((1, D_pad), lambda b: (0, 0))
    scl_spec = pl.BlockSpec((1, 1), lambda b: (0, 0))

    grid_spec = pltpu.PrefetchScalarGridSpec(
        num_scalar_prefetch=0,
        grid=(B,),
        in_specs=[
            batched(T_pad), batched(I_pad),
            w_spec, row_spec, w_spec, row_spec, row_spec, scl_spec,
            w_spec, w_spec, row_spec, row_spec, row_spec, scl_spec,
        ],
        out_specs=[batched(T_pad), batched(T_pad)],
    )

    att_text_p, att_img_p = pl.pallas_call(
        kernel,
        out_shape=(jax.ShapeDtypeStruct((B, T_pad, D_pad), f32),
                   jax.ShapeDtypeStruct((B, T_pad, D_pad), f32)),
        grid_spec=grid_spec,
        compiler_params=pltpu.CompilerParams(dimension_semantics=("parallel",)),
    )(text_p, img_p,
      wt1, bt1, wi1, w1a, w1b, b1,
      wt2, wi2, bi2, w2a, w2b, b2)

    return att_text_p[:, :T, :D], att_img_p[:, :T, :D]


# ----------------------------- pure-JAX reference -----------------------------

def co_attention_reference(text, img, p):
    f32 = jnp.float32
    text = text.astype(f32)
    img = img.astype(f32)
    B, T, D = text.shape
    I = img.shape[1]
    with jax.default_matmul_precision("highest"):
        t_rep = jnp.broadcast_to(text[:, :, None, :], (B, T, I, D))
        i_rep = jnp.broadcast_to(img[:, None, :, :], (B, T, I, D))
        t_rep = t_rep @ p['w_t1'].T + p['b_t1']
        i_rep = i_rep @ p['w_i1'].T
        union = jnp.tanh(jnp.concatenate([t_rep, i_rep], axis=-1))
        scores1 = jnp.einsum('btif,f->bti', union, p['w_1'][0]) + p['b_1'][0]
        visial_att = jax.nn.softmax(scores1, axis=-1)
        att_img = jnp.einsum('bti,bid->btd', visial_att, img)

        t_rep2 = jnp.broadcast_to(text[:, None, :, :], (B, T, T, D))
        i_rep2 = jnp.broadcast_to(att_img[:, :, None, :], (B, T, T, D))
        t_rep2 = t_rep2 @ p['w_t2'].T
        i_rep2 = i_rep2 @ p['w_i2'].T + p['b_i2']
        union2 = jnp.tanh(jnp.concatenate([i_rep2, t_rep2], axis=-1))
        scores2 = jnp.einsum('btjf,f->btj', union2, p['w_2'][0]) + p['b_2'][0]
        text_att = jax.nn.softmax(scores2, axis=-1)
        att_text = jnp.einsum('btj,bjd->btd', text_att, text)
    return att_text, att_img


# ----------------------------- params / main -----------------------------

def init_params(key):
    ks = jax.random.split(key, 6)

    def lin(k, out_f, in_f, bias):
        bound = 1.0 / (in_f ** 0.5)
        kw, kb = jax.random.split(k)
        w = jax.random.uniform(kw, (out_f, in_f), jnp.float32, -bound, bound)
        b = jax.random.uniform(kb, (out_f,), jnp.float32, -bound, bound) if bias else None
        return w, b

    p = {}
    p['w_t1'], p['b_t1'] = lin(ks[0], D_MODEL, D_MODEL, True)    # text_Linear_1 (bias)
    p['w_i1'], _ = lin(ks[1], D_MODEL, D_MODEL, False)           # img_Linear_1 (no bias)
    p['w_1'], p['b_1'] = lin(ks[2], 1, 2 * D_MODEL, True)        # Linear_1
    p['w_t2'], _ = lin(ks[3], D_MODEL, D_MODEL, False)           # text_Linear_2 (no bias)
    p['w_i2'], p['b_i2'] = lin(ks[4], D_MODEL, D_MODEL, True)    # img_Linear_2 (bias)
    p['w_2'], p['b_2'] = lin(ks[5], 1, 2 * D_MODEL, True)        # Linear_2
    return p


if __name__ == "__main__":
    key = jax.random.PRNGKey(0)
    kp, kt, ki = jax.random.split(key, 3)
    params = init_params(kp)

    B = 2
    text_embedding = jax.random.normal(kt, (B, N_TEXT, D_MODEL), jnp.float32)
    img_embedding = jax.random.normal(ki, (B, N_IMG, D_MODEL), jnp.float32)

    att_text, att_img = co_attention_pallas(text_embedding, img_embedding, params)
    att_text, att_img = jax.block_until_ready((att_text, att_img))

    assert att_text.shape == (B, N_TEXT, D_MODEL), att_text.shape
    assert att_img.shape == (B, N_TEXT, D_MODEL), att_img.shape

    ref_text, ref_img = co_attention_reference(text_embedding, img_embedding, params)
    assert jnp.allclose(att_img, ref_img, rtol=2e-2, atol=2e-2)
    assert jnp.allclose(att_text, ref_text, rtol=2e-2, atol=2e-2)

    print("KERNEL_OK")
</pallas_src>

<mosaic_0001>
module attributes {stable_mosaic.version = 11 : i64} {
  func.func @_co_attention_kernel(%arg0: i32, %arg1: memref<1x40x256xf32, #tpu.memory_space<vmem>>, %arg2: memref<1x56x256xf32, #tpu.memory_space<vmem>>, %arg3: memref<256x256xf32, #tpu.memory_space<vmem>>, %arg4: memref<1x256xf32, #tpu.memory_space<vmem>>, %arg5: memref<256x256xf32, #tpu.memory_space<vmem>>, %arg6: memref<1x256xf32, #tpu.memory_space<vmem>>, %arg7: memref<1x256xf32, #tpu.memory_space<vmem>>, %arg8: memref<1x1xf32, #tpu.memory_space<vmem>>, %arg9: memref<256x256xf32, #tpu.memory_space<vmem>>, %arg10: memref<256x256xf32, #tpu.memory_space<vmem>>, %arg11: memref<1x256xf32, #tpu.memory_space<vmem>>, %arg12: memref<1x256xf32, #tpu.memory_space<vmem>>, %arg13: memref<1x256xf32, #tpu.memory_space<vmem>>, %arg14: memref<1x1xf32, #tpu.memory_space<vmem>>, %arg15: memref<1x40x256xf32, #tpu.memory_space<vmem>>, %arg16: memref<1x40x256xf32, #tpu.memory_space<vmem>>) attributes {dimension_semantics = [#tpu.dimension_semantics<parallel>], iteration_bounds = array<i64: 2>, scalar_prefetch = 0 : i64, scratch_operands = 0 : i64, tpu.core_type = #tpu.core_type<tc>, window_params = [{transform_indices = @transform_0, window_bounds = array<i64: 1, 40, 256>}, {transform_indices = @transform_1, window_bounds = array<i64: 1, 56, 256>}, {pipeline_mode = #tpu.pipeline_mode<synchronous>, transform_indices = @transform_2, window_bounds = array<i64: 256, 256>}, {pipeline_mode = #tpu.pipeline_mode<synchronous>, transform_indices = @transform_3, window_bounds = array<i64: 1, 256>}, {pipeline_mode = #tpu.pipeline_mode<synchronous>, transform_indices = @transform_4, window_bounds = array<i64: 256, 256>}, {pipeline_mode = #tpu.pipeline_mode<synchronous>, transform_indices = @transform_5, window_bounds = array<i64: 1, 256>}, {pipeline_mode = #tpu.pipeline_mode<synchronous>, transform_indices = @transform_6, window_bounds = array<i64: 1, 256>}, {pipeline_mode = #tpu.pipeline_mode<synchronous>, transform_indices = @transform_7, window_bounds = array<i64: 1, 1>}, {pipeline_mode = #tpu.pipeline_mode<synchronous>, transform_indices = @transform_8, window_bounds = array<i64: 256, 256>}, {pipeline_mode = #tpu.pipeline_mode<synchronous>, transform_indices = @transform_9, window_bounds = array<i64: 256, 256>}, {pipeline_mode = #tpu.pipeline_mode<synchronous>, transform_indices = @transform_10, window_bounds = array<i64: 1, 256>}, {pipeline_mode = #tpu.pipeline_mode<synchronous>, transform_indices = @transform_11, window_bounds = array<i64: 1, 256>}, {pipeline_mode = #tpu.pipeline_mode<synchronous>, transform_indices = @transform_12, window_bounds = array<i64: 1, 256>}, {pipeline_mode = #tpu.pipeline_mode<synchronous>, transform_indices = @transform_13, window_bounds = array<i64: 1, 1>}, {transform_indices = @transform_14, window_bounds = array<i64: 1, 40, 256>}, {transform_indices = @transform_15, window_bounds = array<i64: 1, 40, 256>}]} {
    %c0 = arith.constant 0 : index
    %c0_0 = arith.constant 0 : index
    %c0_1 = arith.constant 0 : index
    %0 = vector.load %arg1[%c0, %c0_0, %c0_1] : memref<1x40x256xf32, #tpu.memory_space<vmem>>, vector<1x40x256xf32>
    %1 = vector.shape_cast %0 : vector<1x40x256xf32> to vector<40x256xf32>
    %c0_2 = arith.constant 0 : index
    %c0_3 = arith.constant 0 : index
    %c0_4 = arith.constant 0 : index
    %2 = vector.load %arg2[%c0_2, %c0_3, %c0_4] : memref<1x56x256xf32, #tpu.memory_space<vmem>>, vector<1x56x256xf32>
    %3 = vector.shape_cast %2 : vector<1x56x256xf32> to vector<56x256xf32>
    %c0_5 = arith.constant 0 : index
    %c0_6 = arith.constant 0 : index
    %4 = vector.load %arg3[%c0_5, %c0_6] : memref<256x256xf32, #tpu.memory_space<vmem>>, vector<256x256xf32>
    %cst = arith.constant dense<0.000000e+00> : vector<40x256xf32>
    %5 = tpu.matmul %1, %4, %cst {dimension_numbers = #tpu.dot_dimension_numbers<[1], [0], [0], [1], [0, 0, 1, 1], [], []>} : vector<40x256xf32>, vector<256x256xf32>, vector<40x256xf32> -> vector<40x256xf32>
    %c0_7 = arith.constant 0 : index
    %c0_8 = arith.constant 0 : index
    %6 = vector.load %arg4[%c0_7, %c0_8] : memref<1x256xf32, #tpu.memory_space<vmem>>, vector<1x256xf32>
    %7 = vector.broadcast %6 : vector<1x256xf32> to vector<40x256xf32>
    %8 = arith.addf %5, %7 : vector<40x256xf32>
    %9 = math.tanh %8 : vector<40x256xf32>
    %c0_9 = arith.constant 0 : index
    %c0_10 = arith.constant 0 : index
    %10 = vector.load %arg5[%c0_9, %c0_10] : memref<256x256xf32, #tpu.memory_space<vmem>>, vector<256x256xf32>
    %cst_11 = arith.constant dense<0.000000e+00> : vector<56x256xf32>
    %11 = tpu.matmul %3, %10, %cst_11 {dimension_numbers = #tpu.dot_dimension_numbers<[1], [0], [0], [1], [0, 0, 1, 1], [], []>} : vector<56x256xf32>, vector<256x256xf32>, vector<56x256xf32> -> vector<56x256xf32>
    %12 = math.tanh %11 : vector<56x256xf32>
    %c0_12 = arith.constant 0 : index
    %c0_13 = arith.constant 0 : index
    %13 = vector.load %arg6[%c0_12, %c0_13] : memref<1x256xf32, #tpu.memory_space<vmem>>, vector<1x256xf32>
    %14 = vector.shape_cast %13 : vector<1x256xf32> to vector<1x256xf32>
    %15 = vector.broadcast %14 : vector<1x256xf32> to vector<56x256xf32>
    %c0_14 = arith.constant 0 : index
    %c0_15 = arith.constant 0 : index
    %16 = vector.load %arg7[%c0_14, %c0_15] : memref<1x256xf32, #tpu.memory_space<vmem>>, vector<1x256xf32>
    %17 = vector.shape_cast %16 : vector<1x256xf32> to vector<1x256xf32>
    %18 = vector.broadcast %17 : vector<1x256xf32> to vector<40x256xf32>
    %cst_16 = arith.constant dense<0.000000e+00> : vector<40x56xf32>
    %19 = tpu.matmul %9, %15, %cst_16 {dimension_numbers = #tpu.dot_dimension_numbers<[1], [1], [0], [0], [0, 0, 1, 0], [], []>} : vector<40x256xf32>, vector<56x256xf32>, vector<40x56xf32> -> vector<40x56xf32>
    %cst_17 = arith.constant dense<0.000000e+00> : vector<40x56xf32>
    %20 = tpu.matmul %18, %12, %cst_17 {dimension_numbers = #tpu.dot_dimension_numbers<[1], [1], [0], [0], [0, 0, 1, 0], [], []>} : vector<40x256xf32>, vector<56x256xf32>, vector<40x56xf32> -> vector<40x56xf32>
    %21 = arith.addf %19, %20 : vector<40x56xf32>
    %c0_18 = arith.constant 0 : index
    %c0_19 = arith.constant 0 : index
    %22 = vector.load %arg8[%c0_18, %c0_19] : memref<1x1xf32, #tpu.memory_space<vmem>>, vector<1x1xf32>
    %23 = vector.broadcast %22 : vector<1x1xf32> to vector<40x56xf32>
    %24 = arith.addf %21, %23 : vector<40x56xf32>
    %25 = tpu.iota {dimensions = array<i32: 1>} : vector<40x56xi32>
    %c49_i32 = arith.constant 49 : i32
    %26 = vector.broadcast %c49_i32 : i32 to vector<40x56xi32>
    %27 = arith.cmpi slt, %25, %26 : vector<40x56xi32>
    %cst_20 = arith.constant -1.000000e+30 : f32
    %28 = vector.broadcast %cst_20 : f32 to vector<40x56xf32>
    %29 = arith.select %27, %24, %28 : vector<40x56xi1>, vector<40x56xf32>
    %cst_21 = arith.constant dense<0xFF800000> : vector<40xf32>
    %30 = vector.multi_reduction <maximumf>, %29, %cst_21 [1] : vector<40x56xf32> to vector<40xf32>
    %31 = vector.shape_cast %30 : vector<40xf32> to vector<40x1xf32>
    %32 = vector.broadcast %31 : vector<40x1xf32> to vector<40x56xf32>
    %33 = arith.subf %29, %32 : vector<40x56xf32>
    %34 = math.exp %33 : vector<40x56xf32>
    %cst_22 = arith.constant dense<0.000000e+00> : vector<40xf32>
    %35 = vector.multi_reduction <add>, %34, %cst_22 [1] : vector<40x56xf32> to vector<40xf32>
    %36 = vector.shape_cast %35 : vector<40xf32> to vector<40x1xf32>
    %37 = vector.broadcast %36 : vector<40x1xf32> to vector<40x56xf32>
    %38 = arith.divf %34, %37 : vector<40x56xf32>
    %cst_23 = arith.constant dense<0.000000e+00> : vector<40x256xf32>
    %39 = tpu.matmul %38, %3, %cst_23 {dimension_numbers = #tpu.dot_dimension_numbers<[1], [0], [0], [1], [0, 0, 1, 1], [], []>} : vector<40x56xf32>, vector<56x256xf32>, vector<40x256xf32> -> vector<40x256xf32>
    %c0_24 = arith.constant 0 : index
    %c0_25 = arith.constant 0 : index
    %c0_26 = arith.constant 0 : index
    %40 = vector.load %arg16[%c0_24, %c0_25, %c0_26] : memref<1x40x256xf32, #tpu.memory_space<vmem>>, vector<1x40x256xf32>
    %41 = vector.shape_cast %40 : vector<1x40x256xf32> to vector<40x256xf32>
    %42 = vector.shape_cast %39 : vector<40x256xf32> to vector<1x40x256xf32>
    tpu.vector_store %arg16[%c0_24, %c0_25, %c0_26], %42 {strides = array<i32>} : memref<1x40x256xf32, #tpu.memory_space<vmem>>, vector<1x40x256xf32>,
    %c0_27 = arith.constant 0 : index
    %c0_28 = arith.constant 0 : index
    %43 = vector.load %arg10[%c0_27, %c0_28] : memref<256x256xf32, #tpu.memory_space<vmem>>, vector<256x256xf32>
    %cst_29 = arith.constant dense<0.000000e+00> : vector<40x256xf32>
    %44 = tpu.matmul %39, %43, %cst_29 {dimension_numbers = #tpu.dot_dimension_numbers<[1], [0], [0], [1], [0, 0, 1, 1], [], []>} : vector<40x256xf32>, vector<256x256xf32>, vector<40x256xf32> -> vector<40x256xf32>
    %c0_30 = arith.constant 0 : index
    %c0_31 = arith.constant 0 : index
    %45 = vector.load %arg11[%c0_30, %c0_31] : memref<1x256xf32, #tpu.memory_space<vmem>>, vector<1x256xf32>
    %46 = vector.broadcast %45 : vector<1x256xf32> to vector<40x256xf32>
    %47 = arith.addf %44, %46 : vector<40x256xf32>
    %48 = math.tanh %47 : vector<40x256xf32>
    %c0_32 = arith.constant 0 : index
    %c0_33 = arith.constant 0 : index
    %49 = vector.load %arg9[%c0_32, %c0_33] : memref<256x256xf32, #tpu.memory_space<vmem>>, vector<256x256xf32>
    %cst_34 = arith.constant dense<0.000000e+00> : vector<40x256xf32>
    %50 = tpu.matmul %1, %49, %cst_34 {dimension_numbers = #tpu.dot_dimension_numbers<[1], [0], [0], [1], [0, 0, 1, 1], [], []>} : vector<40x256xf32>, vector<256x256xf32>, vector<40x256xf32> -> vector<40x256xf32>
    %51 = math.tanh %50 : vector<40x256xf32>
    %c0_35 = arith.constant 0 : index
    %c0_36 = arith.constant 0 : index
    %52 = vector.load %arg12[%c0_35, %c0_36] : memref<1x256xf32, #tpu.memory_space<vmem>>, vector<1x256xf32>
    %53 = vector.shape_cast %52 : vector<1x256xf32> to vector<1x256xf32>
    %54 = vector.broadcast %53 : vector<1x256xf32> to vector<40x256xf32>
    %c0_37 = arith.constant 0 : index
    %c0_38 = arith.constant 0 : index
    %55 = vector.load %arg13[%c0_37, %c0_38] : memref<1x256xf32, #tpu.memory_space<vmem>>, vector<1x256xf32>
    %56 = vector.shape_cast %55 : vector<1x256xf32> to vector<1x256xf32>
    %57 = vector.broadcast %56 : vector<1x256xf32> to vector<40x256xf32>
    %cst_39 = arith.constant dense<0.000000e+00> : vector<40x40xf32>
    %58 = tpu.matmul %48, %54, %cst_39 {dimension_numbers = #tpu.dot_dimension_numbers<[1], [1], [0], [0], [0, 0, 1, 0], [], []>} : vector<40x256xf32>, vector<40x256xf32>, vector<40x40xf32> -> vector<40x40xf32>
    %cst_40 = arith.constant dense<0.000000e+00> : vector<40x40xf32>
    %59 = tpu.matmul %57, %51, %cst_40 {dimension_numbers = #tpu.dot_dimension_numbers<[1], [1], [0], [0], [0, 0, 1, 0], [], []>} : vector<40x256xf32>, vector<40x256xf32>, vector<40x40xf32> -> vector<40x40xf32>
    %60 = arith.addf %58, %59 : vector<40x40xf32>
    %c0_41 = arith.constant 0 : index
    %c0_42 = arith.constant 0 : index
    %61 = vector.load %arg14[%c0_41, %c0_42] : memref<1x1xf32, #tpu.memory_space<vmem>>, vector<1x1xf32>
    %62 = vector.broadcast %61 : vector<1x1xf32> to vector<40x40xf32>
    %63 = arith.addf %60, %62 : vector<40x40xf32>
    %64 = tpu.iota {dimensions = array<i32: 1>} : vector<40x40xi32>
    %c35_i32 = arith.constant 35 : i32
    %65 = vector.broadcast %c35_i32 : i32 to vector<40x40xi32>
    %66 = arith.cmpi slt, %64, %65 : vector<40x40xi32>
    %cst_43 = arith.constant -1.000000e+30 : f32
    %67 = vector.broadcast %cst_43 : f32 to vector<40x40xf32>
    %68 = arith.select %66, %63, %67 : vector<40x40xi1>, vector<40x40xf32>
    %cst_44 = arith.constant dense<0xFF800000> : vector<40xf32>
    %69 = vector.multi_reduction <maximumf>, %68, %cst_44 [1] : vector<40x40xf32> to vector<40xf32>
    %70 = vector.shape_cast %69 : vector<40xf32> to vector<40x1xf32>
    %71 = vector.broadcast %70 : vector<40x1xf32> to vector<40x40xf32>
    %72 = arith.subf %68, %71 : vector<40x40xf32>
    %73 = math.exp %72 : vector<40x40xf32>
    %cst_45 = arith.constant dense<0.000000e+00> : vector<40xf32>
    %74 = vector.multi_reduction <add>, %73, %cst_45 [1] : vector<40x40xf32> to vector<40xf32>
    %75 = vector.shape_cast %74 : vector<40xf32> to vector<40x1xf32>
    %76 = vector.broadcast %75 : vector<40x1xf32> to vector<40x40xf32>
    %77 = arith.divf %73, %76 : vector<40x40xf32>
    %cst_46 = arith.constant dense<0.000000e+00> : vector<40x256xf32>
    %78 = tpu.matmul %77, %1, %cst_46 {dimension_numbers = #tpu.dot_dimension_numbers<[1], [0], [0], [1], [0, 0, 1, 1], [], []>} : vector<40x40xf32>, vector<40x256xf32>, vector<40x256xf32> -> vector<40x256xf32>
    %c0_47 = arith.constant 0 : index
    %c0_48 = arith.constant 0 : index
    %c0_49 = arith.constant 0 : index
    %79 = vector.load %arg15[%c0_47, %c0_48, %c0_49] : memref<1x40x256xf32, #tpu.memory_space<vmem>>, vector<1x40x256xf32>
    %80 = vector.shape_cast %79 : vector<1x40x256xf32> to vector<40x256xf32>
    %81 = vector.shape_cast %78 : vector<40x256xf32> to vector<1x40x256xf32>
    tpu.vector_store %arg15[%c0_47, %c0_48, %c0_49], %81 {strides = array<i32>} : memref<1x40x256xf32, #tpu.memory_space<vmem>>, vector<1x40x256xf32>,
    return
  }
  func.func @transform_0(%arg0: i32) -> (i32, i32, i32) {
    %c0_i32 = arith.constant 0 : i32
    %c0_i32_0 = arith.constant 0 : i32
    %c0_i32_1 = arith.constant 0 : i32
    return %arg0, %c0_i32, %c0_i32_0 : i32, i32, i32
  }
  func.func @transform_1(%arg0: i32) -> (i32, i32, i32) {
    %c0_i32 = arith.constant 0 : i32
    %c0_i32_0 = arith.constant 0 : i32
    %c0_i32_1 = arith.constant 0 : i32
    return %arg0, %c0_i32, %c0_i32_0 : i32, i32, i32
  }
  func.func @transform_2(%arg0: i32) -> (i32, i32) {
    %c0_i32 = arith.constant 0 : i32
    %c0_i32_0 = arith.constant 0 : i32
    %c0_i32_1 = arith.constant 0 : i32
    return %c0_i32, %c0_i32_0 : i32, i32
  }
  func.func @transform_3(%arg0: i32) -> (i32, i32) {
    %c0_i32 = arith.constant 0 : i32
    %c0_i32_0 = arith.constant 0 : i32
    %c0_i32_1 = arith.constant 0 : i32
    return %c0_i32, %c0_i32_0 : i32, i32
  }
  func.func @transform_4(%arg0: i32) -> (i32, i32) {
    %c0_i32 = arith.constant 0 : i32
    %c0_i32_0 = arith.constant 0 : i32
    %c0_i32_1 = arith.constant 0 : i32
    return %c0_i32, %c0_i32_0 : i32, i32
  }
  func.func @transform_5(%arg0: i32) -> (i32, i32) {
    %c0_i32 = arith.constant 0 : i32
    %c0_i32_0 = arith.constant 0 : i32
    %c0_i32_1 = arith.constant 0 : i32
    return %c0_i32, %c0_i32_0 : i32, i32
  }
  func.func @transform_6(%arg0: i32) -> (i32, i32) {
    %c0_i32 = arith.constant 0 : i32
    %c0_i32_0 = arith.constant 0 : i32
    %c0_i32_1 = arith.constant 0 : i32
    return %c0_i32, %c0_i32_0 : i32, i32
  }
  func.func @transform_7(%arg0: i32) -> (i32, i32) {
    %c0_i32 = arith.constant 0 : i32
    %c0_i32_0 = arith.constant 0 : i32
    %c0_i32_1 = arith.constant 0 : i32
    return %c0_i32, %c0_i32_0 : i32, i32
  }
  func.func @transform_8(%arg0: i32) -> (i32, i32) {
    %c0_i32 = arith.constant 0 : i32
    %c0_i32_0 = arith.constant 0 : i32
    %c0_i32_1 = arith.constant 0 : i32
    return %c0_i32, %c0_i32_0 : i32, i32
  }
  func.func @transform_9(%arg0: i32) -> (i32, i32) {
    %c0_i32 = arith.constant 0 : i32
    %c0_i32_0 = arith.constant 0 : i32
    %c0_i32_1 = arith.constant 0 : i32
    return %c0_i32, %c0_i32_0 : i32, i32
  }
  func.func @transform_10(%arg0: i32) -> (i32, i32) {
    %c0_i32 = arith.constant 0 : i32
    %c0_i32_0 = arith.constant 0 : i32
    %c0_i32_1 = arith.constant 0 : i32
    return %c0_i32, %c0_i32_0 : i32, i32
  }
  func.func @transform_11(%arg0: i32) -> (i32, i32) {
    %c0_i32 = arith.constant 0 : i32
    %c0_i32_0 = arith.constant 0 : i32
    %c0_i32_1 = arith.constant 0 : i32
    return %c0_i32, %c0_i32_0 : i32, i32
  }
  func.func @transform_12(%arg0: i32) -> (i32, i32) {
    %c0_i32 = arith.constant 0 : i32
    %c0_i32_0 = arith.constant 0 : i32
    %c0_i32_1 = arith.constant 0 : i32
    return %c0_i32, %c0_i32_0 : i32, i32
  }
  func.func @transform_13(%arg0: i32) -> (i32, i32) {
    %c0_i32 = arith.constant 0 : i32
    %c0_i32_0 = arith.constant 0 : i32
    %c0_i32_1 = arith.constant 0 : i32
    return %c0_i32, %c0_i32_0 : i32, i32
  }
  func.func @transform_14(%arg0: i32) -> (i32, i32, i32) {
    %c0_i32 = arith.constant 0 : i32
    %c0_i32_0 = arith.constant 0 : i32
    %c0_i32_1 = arith.constant 0 : i32
    return %arg0, %c0_i32, %c0_i32_0 : i32, i32, i32
  }
  func.func @transform_15(%arg0: i32) -> (i32, i32, i32) {
    %c0_i32 = arith.constant 0 : i32
    %c0_i32_0 = arith.constant 0 : i32
    %c0_i32_1 = arith.constant 0 : i32
    return %arg0, %c0_i32, %c0_i32_0 : i32, i32, i32
  }
}

</mosaic_0001>

<bundles_post_ra>
// kernel: tpu_custom_call.1
= control target key start
LH: loop header
LB: loop body
LE: loop exit
PB: predicated region body
PF: predicated region fallthrough
CT: control target
= control target key end

     0   :  { %s4057_s0 = inlined_call_operand.hbm [shape: f32[2,40,256], index: 0, kind: input, shape index: {}]   ;;  %s4058_s1 = inlined_call_operand.hbm [shape: f32[2,56,256], index: 1, kind: input, shape index: {}]   ;;  %s4059_s2 = inlined_call_operand.hbm [shape: f32[256,256], index: 2, kind: input, shape index: {}]   ;;  %s4060_s3 = inlined_call_operand.vmem [shape: f32[1,256], index: 3, kind: input, shape index: {}]   ;;  %s4061_s4 = inlined_call_operand.hbm [shape: f32[256,256], index: 4, kind: input, shape index: {}]   ;;  %s4062_s5 = inlined_call_operand.vmem [shape: f32[1,256], index: 5, kind: input, shape index: {}]   ;;  %s4063_s6 = inlined_call_operand.vmem [shape: f32[1,256], index: 6, kind: input, shape index: {}]   ;;  %s4064_s7 = inlined_call_operand.<no memory space> [shape: f32[1,1], index: 7, kind: input, shape index: {}]   ;;  %s4065_s8 = inlined_call_operand.hbm [shape: f32[256,256], index: 8, kind: input, shape index: {}]   ;;  %s4066_s9 = inlined_call_operand.hbm [shape: f32[256,256], index: 9, kind: input, shape index: {}]   ;;  %s4067_s10 = inlined_call_operand.vmem [shape: f32[1,256], index: 10, kind: input, shape index: {}]   ;;  %s4068_s11 = inlined_call_operand.vmem [shape: f32[1,256], index: 11, kind: input, shape index: {}]   ;;  %s4069_s12 = inlined_call_operand.vmem [shape: f32[1,256], index: 12, kind: input, shape index: {}]   ;;  %s4070_s14 = inlined_call_operand.hbm [shape: f32[2,40,256], index: 14, kind: output, shape index: {0}]   ;;  %s4071_s15 = inlined_call_operand.hbm [shape: f32[2,40,256], index: 15, kind: output, shape index: {1}]   ;;  %s4072_s13 = inlined_call_operand.<no memory space> [shape: f32[1,1], index: 13, kind: input, shape index: {}]  }
   0x1   :  { %4084 = sst [smem:[#allocation27_spill]] %s4057_s0  ;;  %v21_v0 = vstv %s4064_s7  ;;  %v23_v1 = vstv %s4072_s13 }
   0x2   :  { %4085 = sst [smem:[#allocation28_spill]] %s4059_s2  ;;  %22 = vst [vmem:[#allocation2] sm:$0x1] %v21_v0  ;;  %24 = vst [vmem:[#allocation3] sm:$0x1] %v23_v1 }
   0x3   :  { %4086 = sst [smem:[#allocation29_spill]] %s4061_s4 }
   0x4   :  { %4087 = sst [smem:[#allocation30_spill]] %s4065_s8 }
   0x5   :  { %4088 = sst [smem:[#allocation31_spill]] %s4067_s10 }
   0x6   :  { %4089 = sst [smem:[#allocation32_spill]] %s4068_s11 }
   0x7   :  { %4090 = sst [smem:[#allocation33_spill]] %s4069_s12 }
   0x8   :  { %4091 = sst [smem:[#allocation34_spill]] %s4070_s14 }
   0x9   :  { %4092 = sst [smem:[#allocation35_spill]] %s4071_s15 }
   0xa   :  { %25 = vsyncpa [#allocation5], 0 }
   0xb   :  { %27 = vsyncpa [#allocation5 + $0x1], 0 }
   0xc   :  { %28 = vsyncpa [#allocation8], 0 }
   0xd   :  { %30 = vsyncpa [#allocation8 + $0x1], 0 }
   0xe   :  { %31 = vsyncpa [#allocation11], 0 }
   0xf   :  { %32 = vsyncpa [#allocation14], 0 }
  0x10   :  { %33 = vsyncpa [#allocation6], 0 }
  0x11   :  { %35 = vsyncpa [#allocation6 + $0x1], 0 }
  0x12   :  { %36 = vsyncpa [#allocation17], 0 }
  0x13   :  { %38 = vsyncpa [#allocation17 + $0x1], 0  ;;  %s3355_s22 = smov 0   ;;  %s3357_s23 = smov 0  }
  0x14   :  { %s3359_s7 = smov 0   ;;  %s3361_s24 = smov 0  }
  0x15 LB: > { %4093 = sst [smem:[#allocation25_spill]] %s3241_s22  ;;  %s3376_s13 = sadd.s32 4294967295, %s3253_s24   ;;  %s3253_s24 = sphi %s3361_s24, %s4130_s24   ;;  %s3249_s7 = sphi %s3359_s7, %s4129_s7   ;;  %s3245_s23 = sphi %s3357_s23, %s4128_s23   ;;  %s3241_s22 = sphi %s3355_s22, %s4127_s22  }
  0x16   : > { %s2371_s25 = sadd.s32 4294967294, %s3253_s24   ;;  %p64_p0 = scmp.ne.s32.totalorder %s3245_s23, %s3241_s22 }
  0x17   : > { %p4076_p1 = scmp.eq.s32.totalorder %s3376_s13, 0  ;;  %p372_p3 = scmp.eq.s32.totalorder %s2371_s25, 1 }
  0x18   : > { %p2372_p5 = scmp.ge.s32.totalorder %s3253_s24, 1  ;;  %p405_p7 = scmp.lt.s32.totalorder %s3253_s24, 3 }
  0x19   : > { %p3385_p4 = por %p4076_p1, %p64_p0  ;;  %p3390_p6 = por %p372_p3, %p64_p0 }
  0x1a   : > { %p3395_p8 = pnand %p2372_p5, %p405_p7  ;;  %s3255_s29 = smov [#allocation9]  }
  0x1b   : > { %s4094_s26 = scalar_select %p3385_p4, 1, 0 }
  0x1c   : > { %s4095_s27 = scalar_select %p3390_p6, 1, 0 }
  0x1d   : > { %s4097_s28 = scalar_select %p3395_p8, 1, 0 }
  0x1e   : > { %4096 = sst [smem:[#allocation26_spill]] %s4095_s27  ;;  %s417_s30 = sshll.u32 %s3255_s29, 4  ;;  %s3399_s30 = int_to_ptr.vmem [resolvable:$true] %s417_s30 }
  0x1f   : > { %p2749_p9 = pneg %p3395_p8  ;;  %s3256_s17 = smov [#allocation10]  }
  0x20   : > { %s433_s18 = sshll.u32 %s3256_s17, 4  ;;  %s3257_s19 = smov [#allocation12]   ;;  %s3410_s18 = int_to_ptr.vmem [resolvable:$true] %s433_s18 }
  0x21   : > { %p3406_p11 = pnand %p2749_p9, %p4076_p1  ;;  %s3412_s20 = sshll.u32 %s3257_s19, 4  ;;  %s456_s20 = int_to_ptr.vmem [resolvable:$true] %s3412_s20 }
  0x22   : > { %s4099_s2 = sld [smem:[#allocation28_spill]] }
  0x23   : > { %p3422_p13 = pneg %p3406_p11 }
  0x28   : > { %s2967_s29 = scalar_lea.hbm %s4099_s2, 8192 }
  0x29   : > { %p2968_p12 = scmp.ne.s32.totalorder %s4099_s2, %s2967_s29  ;;  %p2974_p5 = scmp.lt.u32.totalorder %s2967_s29, %s4099_s2 }
  0x2b   : > { %p2970_p0 = pnand %p3422_p13, %p2968_p12 }
  0x2d   : > { %p2971_p3 = pneg %p2970_p0 }
  0x2f   : > { %p2976_p7 = pnand %p2974_p5, %p2971_p3 }
  0x31   : > { %2979 = shalt.err (!%p2976_p7)
}
  0x32   : > { %s2980_s22 = scalar_lea.vmem %s3399_s30, 8192  ;;  %p2988_p2 = scmp.lt.s32.totalorder %s3399_s30, %s3399_s30 }
  0x33   : > { %p2981_p9 = scmp.ne.s32.totalorder %s3399_s30, %s2980_s22  ;;  %p2989_p6 = scmp.lt.s32.totalorder %s2980_s22, %s2980_s22 }
  0x35   : > { %p2983_p10 = pnand %p2981_p9, %p3422_p13  ;;  %p2990_p12 = por %p2989_p6, %p2988_p2 }
  0x37   : > { %p2984_p1 = pneg %p2983_p10 }
  0x39   : > { %p2991_p0 = pnand %p2990_p12, %p2984_p1 }
  0x3b   : > { %2994 = shalt.err (!%p2991_p0)
}
  0x3c   : > { %s4080_s27 = smov 256   ;;  %s4082_s21 = smov 16  }
  0x3d   : > { %2752 = dma.hbm_to_vmem [thread:$0]  (!%p3406_p11), %s4099_s2, 8192, %s3399_s30, [#allocation8], %s4080_s27, %s4080_s27, %s4082_s21  }
  0x3e   : > { %s4101_s4 = sld [smem:[#allocation29_spill]] }
  0x44   : > { %s2995_s22 = scalar_lea.hbm %s4101_s4, 8192 }
  0x45   : > { %p2996_p1 = scmp.ne.s32.totalorder %s4101_s4, %s2995_s22  ;;  %p3002_p10 = scmp.lt.u32.totalorder %s2995_s22, %s4101_s4 }
  0x47   : > { %p2998_p2 = pnand %p2996_p1, %p3422_p13 }
  0x49   : > { %p2999_p6 = pneg %p2998_p2 }
  0x4b   : > { %p3004_p3 = pnand %p3002_p10, %p2999_p6 }
  0x4d   : > { %3007 = shalt.err (!%p3004_p3)
}
  0x4e   : > { %s3008_s30 = scalar_lea.vmem %s3410_s18, 8192  ;;  %p3016_p12 = scmp.lt.s32.totalorder %s3410_s18, %s3410_s18 }
  0x4f   : > { %p3009_p5 = scmp.ne.s32.totalorder %s3410_s18, %s3008_s30  ;;  %p3017_p0 = scmp.lt.s32.totalorder %s3008_s30, %s3008_s30 }
  0x51   : > { %p3011_p7 = pnand %p3009_p5, %p3422_p13  ;;  %p3018_p1 = por %p3017_p0, %p3016_p12 }
  0x53   : > { %p3012_p9 = pneg %p3011_p7 }
  0x55   : > { %p3019_p2 = pnand %p3018_p1, %p3012_p9 }
  0x57   : > { %3022 = shalt.err (!%p3019_p2)
}
  0x58   : > { %2755 = dma.hbm_to_vmem [thread:$0]  (!%p3406_p11), %s4101_s4, 8192, %s3410_s18, [#allocation11], %s4080_s27, %s4080_s27, %s4082_s21  }
  0x59   : > { %s4102_s8 = sld [smem:[#allocation30_spill]] }
  0x5f   : > { %s3023_s25 = scalar_lea.hbm %s4102_s8, 8192 }
  0x60   : > { %p3024_p6 = scmp.ne.s32.totalorder %s4102_s8, %s3023_s25  ;;  %p3030_p5 = scmp.lt.u32.totalorder %s3023_s25, %s4102_s8 }
  0x62   : > { %p3026_p10 = pnand %p3024_p6, %p3422_p13 }
  0x64   : > { %p3027_p3 = pneg %p3026_p10 }
  0x66   : > { %p3032_p7 = pnand %p3030_p5, %p3027_p3 }
  0x68   : > { %3035 = shalt.err (!%p3032_p7)
}
  0x69   : > { %s3036_s30 = scalar_lea.vmem %s456_s20, 8192  ;;  %p3044_p1 = scmp.lt.s32.totalorder %s456_s20, %s456_s20 }
  0x6a   : > { %p3037_p9 = scmp.ne.s32.totalorder %s456_s20, %s3036_s30  ;;  %p3045_p2 = scmp.lt.s32.totalorder %s3036_s30, %s3036_s30 }
  0x6c   : > { %p3039_p12 = pnand %p3037_p9, %p3422_p13  ;;  %p3046_p4 = por %p3045_p2, %p3044_p1 }
  0x6e   : > { %p3040_p0 = pneg %p3039_p12 }
  0x70   : > { %p3047_p8 = pnand %p3046_p4, %p3040_p0 }
  0x72   : > { %3050 = shalt.err (!%p3047_p8)
}
  0x73   : > { %2758 = dma.hbm_to_vmem [thread:$0]  (!%p3406_p11), %s4102_s8, 8192, %s456_s20, [#allocation11], %s4080_s27, %s4080_s27, %s4082_s21  }
  0x74   : > { %s3260_s11 = smov [#allocation13]   ;;  %s3051_s29 = scalar_lea.hbm %s4066_s9, 8192 }
  0x75   : > { %s468_s12 = sshll.u32 %s3260_s11, 4  ;;  %p3052_p4 = scmp.ne.s32.totalorder %s4066_s9, %s3051_s29  ;;  %s469_s12 = int_to_ptr.vmem [resolvable:$true] %s468_s12 }
  0x76   : > { %p3058_p10 = scmp.lt.u32.totalorder %s3051_s29, %s4066_s9 }
  0x77   : > { %p3054_p8 = pnand %p3052_p4, %p3422_p13 }
  0x79   : > { %p3055_p6 = pneg %p3054_p8 }
  0x7b   : > { %p3060_p3 = pnand %p3058_p10, %p3055_p6 }
  0x7d   : > { %3063 = shalt.err (!%p3060_p3)
}
  0x7e   : > { %s3064_s20 = scalar_lea.vmem %s469_s12, 8192  ;;  %p3072_p12 = scmp.lt.s32.totalorder %s469_s12, %s469_s12 }
  0x7f   : > { %p3065_p5 = scmp.ne.s32.totalorder %s469_s12, %s3064_s20  ;;  %p3073_p0 = scmp.lt.s32.totalorder %s3064_s20, %s3064_s20 }
  0x81   : > { %p3067_p7 = pnand %p3065_p5, %p3422_p13  ;;  %p3074_p1 = por %p3073_p0, %p3072_p12 }
  0x83   : > { %p3068_p9 = pneg %p3067_p7 }
  0x85   : > { %p3075_p2 = pnand %p3074_p1, %p3068_p9 }
  0x87   : > { %3078 = shalt.err (!%p3075_p2)
}
  0x88   : > { %2761 = dma.hbm_to_vmem [thread:$0]  (!%p3406_p11), %s4066_s9, 8192, %s469_s12, [#allocation14], %s4080_s27, %s4080_s27, %s4082_s21  }
  0x89   : > { %s3516_s14 = sadd.s32 1, %s3253_s24   ;;  %s51_s16 = sadd.s32 1, %s3249_s7 }
  0x8a   : > { %s48_s11 = ssub.s32 %s3253_s24, %s3516_s14  ;;  %p58_p13 = scmp.ne.s32.totalorder %s3249_s7, %s3245_s23 }
  0x8b   : > { %p49_p4 = scmp.eq.s32.totalorder %s48_s11, 0  ;;  %p59_p8 = scmp.eq.s32.totalorder %s3253_s24, 0 }
  0x8c   : > { %p4103_p6 = scmp.eq.s32.totalorder %s3376_s13, 1  ;;  %p2780_p3 = scmp.lt.s32.totalorder %s3253_s24, 2 }
  0x8d   : > { %s3532_s25 = scalar_select %p49_p4, %s3249_s7, %s51_s16  }
  0x8e   : > { %p3526_p10 = por %p4103_p6, %p58_p13  ;;  %p60_p5 = por %p59_p8, %p58_p13 }
  0x8f   : > { %s3535_s29 = sand.u32 1, %s3249_s7   ;;  %s2718_s17 = smul.u32 1280, %s3253_s24 }
  0x90   : > { %s2717_s12 = smul.u32 80, %s3535_s29  ;;  %p3539_p11 = pnand %p2780_p3, %p60_p5 }
  0x91   : > { %s4106_s0 = sld [smem:[#allocation27_spill]]  ;;  %s495_s11 = scalar_lea.sflag [#allocation5], %s3535_s29 }
  0x92   : > { %s498_s10 = scalar_lea.vmem [#allocation4], %s2717_s12  ;;  %p3081_p9 = pneg %p3539_p11 }
  0x93   : > { %s505_s16 = sshll.u32 %s498_s10, 4  ;;  %s3549_s16 = int_to_ptr.vmem [resolvable:$true] %s505_s16 }
  0x97   : > { %s3547_s18 = scalar_lea.hbm %s4106_s0, %s2718_s17  ;;  %s3084_s20 = scalar_lea.hbm %s4106_s0, 2560 }
  0x98   : > { %s3079_s27 = scalar_lea.hbm %s3547_s18, 1280  ;;  %p3085_p1 = scmp.lt.u32.totalorder %s3547_s18, %s4106_s0 }
  0x99   : > { %p3080_p7 = scmp.ne.s32.totalorder %s3547_s18, %s3079_s27  ;;  %p3086_p2 = scmp.lt.u32.totalorder %s3084_s20, %s3079_s27 }
  0x9a   : > { %p3088_p4 = scmp.lt.u32.totalorder %s3079_s27, %s3547_s18 }
  0x9b   : > { %p3082_p12 = pnand %p3081_p9, %p3080_p7  ;;  %p3087_p13 = por %p3086_p2, %p3085_p1 }
  0x9d   : > { %p3083_p0 = pneg %p3082_p12  ;;  %p3089_p8 = por %p3088_p4, %p3087_p13 }
  0x9f   : > { %p3090_p6 = pnand %p3089_p8, %p3083_p0 }
  0xa1   : > { %3093 = shalt.err (!%p3090_p6)
}
  0xa2   : > { %s3094_s12 = scalar_lea.vmem %s3549_s16, 1280  ;;  %s3261_s10 = smov [#allocation4]  }
  0xa3   : > { %p3095_p3 = scmp.ne.s32.totalorder %s3549_s16, %s3094_s12  ;;  %s3099_s30 = sshll.u32 %s3261_s10, 4  ;;  %s3100_s30 = int_to_ptr.vmem [resolvable:$false] %s3099_s30 }
  0xa4   : > { %s3101_s21 = scalar_lea.vmem %s3100_s30, 2560  ;;  %p3102_p12 = scmp.lt.s32.totalorder %s3549_s16, %s3100_s30 }
  0xa5   : > { %p3097_p5 = pnand %p3095_p3, %p3081_p9  ;;  %p3103_p1 = scmp.lt.s32.totalorder %s3101_s21, %s3094_s12 }
  0xa7   : > { %p3098_p7 = pneg %p3097_p5  ;;  %p3104_p2 = por %p3103_p1, %p3102_p12 }
  0xa9   : > { %p3105_p13 = pnand %p3104_p2, %p3098_p7 }
  0xab   : > { %3108 = shalt.err (!%p3105_p13)
}
  0xac   : > { %s4107_s27 = smov 16   ;;  %s4108_s22 = smov 256  }
  0xad   : > { %2765 = dma.hbm_to_vmem [thread:$0]  (!%p3539_p11), %s3547_s18, 1280, %s3549_s16, %s495_s11, %s4108_s22, %s4108_s22, %s4107_s27  }
  0xae   : > { %s2719_s17 = smul.u32 112, %s3535_s29  ;;  %s4109_s2 = sand.u32 1, %s3253_s24  }
  0xaf   : > { %s2720_s20 = smul.u32 1792, %s3253_s24  ;;  %s3593_s4 = scalar_lea.sflag [#allocation8], %s4109_s2 }
  0xb0   : > { %s519_s21 = scalar_lea.vmem [#allocation7], %s2719_s17  ;;  %s3114_s16 = scalar_lea.hbm %s4058_s1, 3584 }
  0xb1   : > { %s3587_s30 = scalar_lea.hbm %s4058_s1, %s2720_s20  ;;  %s526_s0 = sshll.u32 %s519_s21, 4  ;;  %s3589_s0 = int_to_ptr.vmem [resolvable:$true] %s526_s0 }
  0xb2   : > { %s3109_s8 = scalar_lea.hbm %s3587_s30, 1792  ;;  %p3115_p6 = scmp.lt.u32.totalorder %s3587_s30, %s4058_s1 }
  0xb3   : > { %p3110_p0 = scmp.ne.s32.totalorder %s3587_s30, %s3109_s8  ;;  %p3116_p3 = scmp.lt.u32.totalorder %s3114_s16, %s3109_s8 }
  0xb4   : > { %p3118_p7 = scmp.lt.u32.totalorder %s3109_s8, %s3587_s30 }
  0xb5   : > { %p3112_p4 = pnand %p3110_p0, %p3081_p9  ;;  %p3117_p5 = por %p3116_p3, %p3115_p6 }
  0xb7   : > { %p3113_p8 = pneg %p3112_p4  ;;  %p3119_p12 = por %p3118_p7, %p3117_p5 }
  0xb9   : > { %p3120_p1 = pnand %p3119_p12, %p3113_p8 }
  0xbb   : > { %3123 = shalt.err (!%p3120_p1)
}
  0xbc   : > { %s3124_s2 = scalar_lea.vmem %s3589_s0, 1792  ;;  %s3262_s17 = smov [#allocation7]  }
  0xbd   : > { %p3125_p2 = scmp.ne.s32.totalorder %s3589_s0, %s3124_s2  ;;  %s3129_s12 = sshll.u32 %s3262_s17, 4  ;;  %s3130_s12 = int_to_ptr.vmem [resolvable:$false] %s3129_s12 }
  0xbe   : > { %s3131_s10 = scalar_lea.vmem %s3130_s12, 3584  ;;  %p3132_p4 = scmp.lt.s32.totalorder %s3589_s0, %s3130_s12 }
  0xbf   : > { %p3127_p13 = pnand %p3125_p2, %p3081_p9  ;;  %p3133_p6 = scmp.lt.s32.totalorder %s3131_s10, %s3124_s2 }
  0xc1   : > { %p3128_p0 = pneg %p3127_p13  ;;  %p3134_p3 = por %p3133_p6, %p3132_p4 }
  0xc3   : > { %p3135_p5 = pnand %p3134_p3, %p3128_p0 }
  0xc5   : > { %3138 = shalt.err (!%p3135_p5)
}
  0xc6   : > { %2768 = dma.hbm_to_vmem [thread:$0]  (!%p3539_p11), %s3587_s30, 1792, %s3589_s0, %s3593_s4, %s4108_s22, %s4108_s22, %s4107_s27  }
  0xc7   : > { %p4110_p9 = scmp.ne.s32.totalorder %s4097_s28, 0 }
  0xc8   : > { %s3625_s8 = sand.u32 (!%p4110_p9), 1, %s3245_s23   ;;  %p4111_p8 = scmp.ne.s32.totalorder (!%p4110_p9), %s4094_s26, 0 }
  0xc9   : > { %538 = sbr.rel (%p4110_p9) target bundleno = 2294 (0x8f6), region = 76  ;;  %s541_s19 = scalar_lea.sflag (!%p4110_p9), [#allocation5], %s3625_s8 }
  0xca   : > { %s3628_s21 = smul.u32 (!%p4110_p9), 80, %s3625_s8 }
  0xcc   : > { %s3632_s29 = scalar_lea.vmem (!%p4110_p9), [#allocation4], %s3628_s21 }
  0xd0   : > { %3212 = dma.done.wait (%p4111_p8), %s541_s19, 1280  }
  0xd1   : > { %3214 = vsyncadd (%p4111_p8), %s541_s19, 4294966016  ;;  %s549_s0 = sand.u32 1, %s3376_s13   ;;  %s2722_s4 = smul.u32 112, %s3625_s8 }
  0xd2   : > { %s550_s28 = scalar_lea.sflag [#allocation8], %s549_s0 }
  0xd3   : > { %s3640_s27 = scalar_lea.vmem [#allocation7], %s2722_s4 }
  0xd4   : > { %3216 = dma.done.wait (%p4111_p8), %s550_s28, 1792  }
  0xd5   : > { %3218 = vsyncadd (%p4111_p8), %s550_s28, 4294965504  ;;  %p4112_p11 = scmp.eq.s32.totalorder %s3376_s13, 0 }
  0xd7   : > { %3220 = dma.done.wait (%p4112_p11), [#allocation8], 8192   ;;  %p4113_p7 = pmov %p4112_p11 }
  0xd9   : > { %3222 = vsyncadd (%p4113_p7), [#allocation8], 4294959104  ;;  %p4114_p12 = pmov %p4113_p7 }
  0xda   : > { %p4115_p1 = pmov %p4113_p7 }
  0xdb   : > { %3224 = dma.done.wait (%p4114_p12), [#allocation11], 16384  }
  0xdc   : > { %3226 = vsyncadd (%p4115_p1), [#allocation11], 4294950912  ;;  %p4116_p2 = pmov %p4115_p1 }
  0xdd   : > { %p4117_p13 = pmov %p4115_p1 }
  0xde   : > { %3228 = dma.done.wait (%p4116_p2), [#allocation14], 8192  }
  0xdf   : > { %3230 = vsyncadd (%p4117_p13), [#allocation14], 4294959104  ;;  %v832_v2 = vld [vmem:[#allocation10 + $0x8] sm:$0xff]  ;;  %v834_v3 = vld [vmem:[#allocation10 + $0x18] sm:$0xff]  ;;  %vm1243_vm1 = vcmask 457728   ;;  %s4118_s17 = sld [smem:[#allocation32_spill]] }
  0xe0   : > { %v831_v4 = vld [vmem:[#allocation10] sm:$0xff]  ;;  %v2465_v5 = vpack.c.bf16 %v834_v3, %v832_v2  ;;  %v833_v6 = vld [vmem:[#allocation10 + $0x10] sm:$0xff]  ;;  %v836_v7 = vld [vmem:[#allocation10 + $0x28] sm:$0xff]  ;;  %s3901_s12 = scalar_lea.vmem [#allocation16], %s3628_s21  ;;  %s4120_s28 = sld [smem:[#allocation31_spill]]  ;;  %vm1994_vm3 = vcmask 326656  }
  0xe1   : > { %v838_v8 = vld [vmem:[#allocation10 + $0x38] sm:$0xff]  ;;  %v2467_v9 = vpack.c.bf16 %v833_v6, %v831_v4  ;;  %v835_v11 = vld [vmem:[#allocation10 + $0x20] sm:$0xff]  ;;  %v837_v12 = vld [vmem:[#allocation10 + $0x30] sm:$0xff]  ;;  %s2723_s26 = smul.u32 1280, %s3376_s13  ;;  %s4121_s18 = sld [smem:[#allocation35_spill]] }
  0xe2   : > { %v2469_v10 = vpack.c.bf16 %v838_v8, %v836_v7  ;;  %v840_v13 = vld [vmem:[#allocation10 + $0x48] sm:$0xff]  ;;  %2466 = vmatprep.subr.bf16.mxu1 %v2465_v5  ;;  %v842_v14 = vld [vmem:[#allocation10 + $0x58] sm:$0xff]  ;;  %v2471_v15 = vpack.c.bf16 %v837_v12, %v835_v11  ;;  %v839_v17 = vld [vmem:[#allocation10 + $0x40] sm:$0xff]  ;;  %s2176_s11 = scalar_lea.sflag [#allocation17], %s3625_s8  ;;  %s3265_s2 = smov [#allocation16]  }
  0xe3   : > { %2468 = vmatpush1.bf16.msra.mxu1 %v2467_v9  ;;  %v2473_v16 = vpack.c.bf16 %v842_v14, %v840_v13  ;;  %v841_v18 = vld [vmem:[#allocation10 + $0x50] sm:$0xff]  ;;  %v844_v19 = vld [vmem:[#allocation10 + $0x68] sm:$0xff]  ;;  %v846_v20 = vld [vmem:[#allocation10 + $0x78] sm:$0xff] }
  0xe4   : > { %2470 = vmatprep.subr.bf16.mxu1 %v2469_v10  ;;  %v2475_v21 = vpack.c.bf16 %v841_v18, %v839_v17  ;;  %v2477_v22 = vpack.c.bf16 %v846_v20, %v844_v19  ;;  %v843_v23 = vld [vmem:[#allocation10 + $0x60] sm:$0xff]  ;;  %v845_v24 = vld [vmem:[#allocation10 + $0x70] sm:$0xff]  ;;  %v848_v25 = vld [vmem:[#allocation10 + $0x88] sm:$0xff] }
  0xe5   : > { %v850_v26 = vld [vmem:[#allocation10 + $0x98] sm:$0xff]  ;;  %v651_v27 = vld [vmem:[#allocation9 + $0x8] sm:$0xff]  ;;  %v650_v29 = vld [vmem:[#allocation9] sm:$0xff]  ;;  %v2479_v31 = vpack.c.bf16 %v845_v24, %v843_v23 }
  0xe6   : > { %v653_v28 = vld [vmem:[#allocation9 + $0x18] sm:$0xff]  ;;  %v652_v30 = vld [vmem:[#allocation9 + $0x10] sm:$0xff]  ;;  %v847_v32 = vld [vmem:[#allocation10 + $0x80] sm:$0xff]  ;;  %v2481_v36 = vpack.c.bf16 %v850_v26, %v848_v25 }
  0xe7   : > { %2472 = vmatpush1.bf16.msra.mxu1 %v2471_v15  ;;  %v849_v33 = vld [vmem:[#allocation10 + $0x90] sm:$0xff]  ;;  %v2401_v34 = vpack.c.bf16 %v653_v28, %v651_v27  ;;  %v2403_v35 = vpack.c.bf16 %v652_v30, %v650_v29  ;;  %v852_v37 = vld [vmem:[#allocation10 + $0xa8] sm:$0xff]  ;;  %v657_v39 = vld [vmem:[#allocation9 + $0x38] sm:$0xff]  ;;  %s3973_s16 = scalar_lea.hbm %s4121_s18, %s2723_s26 }
  0xe8   : > { %2474 = vmatprep.subr.bf16.mxu1 %v2473_v16  ;;  %v655_v38 = vld [vmem:[#allocation9 + $0x28] sm:$0xff]  ;;  %v854_v40 = vld [vmem:[#allocation10 + $0xb8] sm:$0xff]  ;;  %v654_v42 = vld [vmem:[#allocation9 + $0x20] sm:$0xff]  ;;  %v2483_v45 = vpack.c.bf16 %v849_v33, %v847_v32 }
  0xe9   : > { %2402 = vmatprep.subr.bf16.mxu0 %v2401_v34  ;;  %v2405_v41 = vpack.c.bf16 %v657_v39, %v655_v38  ;;  %v656_v43 = vld [vmem:[#allocation9 + $0x30] sm:$0xff]  ;;  %v659_v46 = vld [vmem:[#allocation9 + $0x48] sm:$0xff]  ;;  %v661_v47 = vld [vmem:[#allocation9 + $0x58] sm:$0xff]  ;;  %v2485_v49 = vpack.c.bf16 %v854_v40, %v852_v37 }
  0xea   : > { %2404 = vmatpush1.bf16.msra.mxu0 %v2403_v35  ;;  %v2407_v44 = vpack.c.bf16 %v656_v43, %v654_v42  ;;  %v658_v48 = vld [vmem:[#allocation9 + $0x40] sm:$0xff]  ;;  %v853_v51 = vld [vmem:[#allocation10 + $0xb0] sm:$0xff]  ;;  %v2409_v52 = vpack.c.bf16 %v661_v47, %v659_v46  ;;  %v856_v54 = vld [vmem:[#allocation10 + $0xc8] sm:$0xff] }
  0xeb   : > { %2476 = vmatpush1.bf16.msra.mxu1 %v2475_v21  ;;  %2406 = vmatprep.subr.bf16.mxu0 %v2405_v41  ;;  %v851_v50 = vld [vmem:[#allocation10 + $0xa0] sm:$0xff]  ;;  %v660_v53 = vld [vmem:[#allocation9 + $0x50] sm:$0xff]  ;;  %v858_v55 = vld [vmem:[#allocation10 + $0xd8] sm:$0xff] }
  0xec   : > { %2478 = vmatprep.subr.bf16.mxu1 %v2477_v22  ;;  %v663_v56 = vld [vmem:[#allocation9 + $0x68] sm:$0xff]  ;;  %v2411_v57 = vpack.c.bf16 %v660_v53, %v658_v48  ;;  %v665_v58 = vld [vmem:[#allocation9 + $0x78] sm:$0xff]  ;;  %v2487_v59 = vpack.c.bf16 %v853_v51, %v851_v50  ;;  %v855_v60 = vld [vmem:[#allocation10 + $0xc0] sm:$0xff]  ;;  %v2489_v0 = vpack.c.bf16 %v858_v55, %v856_v54 }
  0xed   : > { %v2413_v61 = vpack.c.bf16 %v665_v58, %v663_v56  ;;  %v662_v62 = vld [vmem:[#allocation9 + $0x60] sm:$0xff]  ;;  %v664_v63 = vld [vmem:[#allocation9 + $0x70] sm:$0xff]  ;;  %v667_v2 = vld [vmem:[#allocation9 + $0x88] sm:$0xff] }
  0xee   : > { %2408 = vmatpush1.bf16.msra.mxu0 %v2407_v44  ;;  %v857_v1 = vld [vmem:[#allocation10 + $0xd0] sm:$0xff]  ;;  %v669_v3 = vld [vmem:[#allocation9 + $0x98] sm:$0xff]  ;;  %v860_v4 = vld [vmem:[#allocation10 + $0xe8] sm:$0xff]  ;;  %v2415_v6 = vpack.c.bf16 %v664_v63, %v662_v62 }
  0xef   : > { %2480 = vmatpush1.bf16.msra.mxu1 %v2479_v31  ;;  %2410 = vmatprep.subr.bf16.mxu0 %v2409_v52  ;;  %v862_v5 = vld [vmem:[#allocation10 + $0xf8] sm:$0xff]  ;;  %v2491_v7 = vpack.c.bf16 %v857_v1, %v855_v60  ;;  %v859_v8 = vld [vmem:[#allocation10 + $0xe0] sm:$0xff]  ;;  %v2417_v9 = vpack.c.bf16 %v669_v3, %v667_v2  ;;  %v668_v11 = vld [vmem:[#allocation9 + $0x90] sm:$0xff] }
  0xf0   : > { %2482 = vmatprep.subr.bf16.mxu1 %v2481_v36  ;;  %v666_v10 = vld [vmem:[#allocation9 + $0x80] sm:$0xff]  ;;  %v2493_v12 = vpack.c.bf16 %v862_v5, %v860_v4  ;;  %v861_v13 = vld [vmem:[#allocation10 + $0xf0] sm:$0xff]  ;;  %v671_v14 = vld [vmem:[#allocation9 + $0xa8] sm:$0xff] }
  0xf1   : > { %v673_v15 = vld [vmem:[#allocation9 + $0xb8] sm:$0xff]  ;;  %v864_v16 = vld [vmem:[#allocation10 + $0x108] sm:$0xff]  ;;  %v2419_v18 = vpack.c.bf16 %v668_v11, %v666_v10  ;;  %v2495_v19 = vpack.c.bf16 %v861_v13, %v859_v8  ;;  %v863_v20 = vld [vmem:[#allocation10 + $0x100] sm:$0xff] }
  0xf2   : > { %2412 = vmatpush1.bf16.msra.mxu0 %v2411_v57  ;;  %v866_v17 = vld [vmem:[#allocation10 + $0x118] sm:$0xff]  ;;  %v2421_v21 = vpack.c.bf16 %v673_v15, %v671_v14  ;;  %v670_v22 = vld [vmem:[#allocation9 + $0xa0] sm:$0xff]  ;;  %v672_v23 = vld [vmem:[#allocation9 + $0xb0] sm:$0xff] }
  0xf3   : > { %2484 = vmatpush1.bf16.msra.mxu1 %v2483_v45  ;;  %2414 = vmatprep.subr.bf16.mxu0 %v2413_v61  ;;  %v2497_v24 = vpack.c.bf16 %v866_v17, %v864_v16  ;;  %v865_v25 = vld [vmem:[#allocation10 + $0x110] sm:$0xff]  ;;  %v675_v26 = vld [vmem:[#allocation9 + $0xc8] sm:$0xff]  ;;  %v677_v27 = vld [vmem:[#allocation9 + $0xd8] sm:$0xff]  ;;  %v2423_v32 = vpack.c.bf16 %v672_v23, %v670_v22 }
  0xf4   : > { %2486 = vmatprep.subr.bf16.mxu1 %v2485_v49  ;;  %v868_v28 = vld [vmem:[#allocation10 + $0x128] sm:$0xff]  ;;  %v870_v29 = vld [vmem:[#allocation10 + $0x138] sm:$0xff]  ;;  %v867_v30 = vld [vmem:[#allocation10 + $0x120] sm:$0xff]  ;;  %v2499_v33 = vpack.c.bf16 %v865_v25, %v863_v20  ;;  %v2425_v34 = vpack.c.bf16 %v677_v27, %v675_v26 }
  0xf5   : > { %v869_v31 = vld [vmem:[#allocation10 + $0x130] sm:$0xff]  ;;  %v674_v35 = vld [vmem:[#allocation9 + $0xc0] sm:$0xff]  ;;  %v679_v37 = vld [vmem:[#allocation9 + $0xe8] sm:$0xff]  ;;  %v2501_v38 = vpack.c.bf16 %v870_v29, %v868_v28 }
  0xf6   : > { %2416 = vmatpush1.bf16.msra.mxu0 %v2415_v6  ;;  %v676_v36 = vld [vmem:[#allocation9 + $0xd0] sm:$0xff]  ;;  %v681_v39 = vld [vmem:[#allocation9 + $0xf8] sm:$0xff]  ;;  %v872_v42 = vld [vmem:[#allocation10 + $0x148] sm:$0xff]  ;;  %v2503_v49 = vpack.c.bf16 %v869_v31, %v867_v30 }
  0xf7   : > { %2488 = vmatpush1.bf16.msra.mxu1 %v2487_v59  ;;  %2418 = vmatprep.subr.bf16.mxu0 %v2417_v9  ;;  %v3659_v40 = vld [vmem:[%s3640_s27 + $0x8] sm:$0xff]  ;;  %v3662_v41 = vld [vmem:[%s3640_s27 + $0x18] sm:$0xff]  ;;  %v871_v45 = vld [vmem:[#allocation10 + $0x140] sm:$0xff]  ;;  %v2427_v46 = vpack.c.bf16 %v676_v36, %v674_v35  ;;  %v2429_v51 = vpack.c.bf16 %v681_v39, %v679_v37 }
  0xf8   : > { %2490 = vmatprep.subr.bf16.mxu1 %v2489_v0  ;;  %v874_v43 = vld [vmem:[#allocation10 + $0x158] sm:$0xff]  ;;  %959 = vmatprep.mubr.f32.mxu1 %v3659_v40  ;;  %v2553_v44 = vpack.c.bf16 %v3662_v41, %v3659_v40  ;;  %v3668_v47 = vld [vmem:[%s3640_s27] sm:$0xff]  ;;  %v3671_v48 = vld [vmem:[%s3640_s27 + $0x10] sm:$0xff] }
  0xf9   : > { %v873_v50 = vld [vmem:[#allocation10 + $0x150] sm:$0xff]  ;;  %v678_v52 = vld [vmem:[#allocation9 + $0xe0] sm:$0xff]  ;;  %v2555_v54 = vpack.c.bf16 %v3671_v48, %v3668_v47  ;;  %v2505_v55 = vpack.c.bf16 %v874_v43, %v872_v42  ;;  %v876_v56 = vld [vmem:[#allocation10 + $0x168] sm:$0xff] }
  0xfa   : > { %2420 = vmatpush1.bf16.msra.mxu0 %v2419_v18  ;;  %v680_v53 = vld [vmem:[#allocation9 + $0xf0] sm:$0xff]  ;;  %v683_v57 = vld [vmem:[#allocation9 + $0x108] sm:$0xff]  ;;  %v685_v58 = vld [vmem:[#allocation9 + $0x118] sm:$0xff]  ;;  %v2507_v62 = vpack.c.bf16 %v873_v50, %v871_v45 }
  0xfb   : > { %2492 = vmatpush1.bf16.msra.mxu1 %v2491_v7  ;;  %2422 = vmatprep.subr.bf16.mxu0 %v2421_v21  ;;  %v878_v59 = vld [vmem:[#allocation10 + $0x178] sm:$0xff]  ;;  %v875_v60 = vld [vmem:[#allocation10 + $0x160] sm:$0xff]  ;;  %v2431_v63 = vpack.c.bf16 %v680_v53, %v678_v52  ;;  %v877_v3 = vld [vmem:[#allocation10 + $0x170] sm:$0xff]  ;;  %v2433_v4 = vpack.c.bf16 %v685_v58, %v683_v57 }
  0xfc   : > { %2494 = vmatprep.subr.bf16.mxu1 %v2493_v12  ;;  %v3676_v61 = vld [vmem:[%s3640_s27 + $0x28] sm:$0xff]  ;;  %v3679_v0 = vld [vmem:[%s3640_s27 + $0x20] sm:$0xff]  ;;  %v3682_v1 = vld [vmem:[%s3640_s27 + $0x38] sm:$0xff]  ;;  %v2509_v9 = vpack.c.bf16 %v878_v59, %v876_v56  ;;  %v2511_v15 = vpack.c.bf16 %v877_v3, %v875_v60 }
  0xfd   : > { %v3685_v2 = vld [vmem:[%s3640_s27 + $0x30] sm:$0xff]  ;;  %v2557_v7 = vpack.c.bf16 %v3682_v1, %v3676_v61  ;;  %v687_v10 = vld [vmem:[#allocation9 + $0x128] sm:$0xff]  ;;  %v689_v11 = vld [vmem:[#allocation9 + $0x138] sm:$0xff] }
  0xfe   : > { %2424 = vmatpush1.bf16.msra.mxu0 %v2423_v32  ;;  %v682_v5 = vld [vmem:[#allocation9 + $0x100] sm:$0xff]  ;;  %v684_v6 = vld [vmem:[#allocation9 + $0x110] sm:$0xff]  ;;  %v2559_v8 = vpack.c.bf16 %v3685_v2, %v3679_v0  ;;  %v880_v12 = vld [vmem:[#allocation10 + $0x188] sm:$0xff]  ;;  %v2437_v21 = vpack.c.bf16 %v689_v11, %v687_v10 }
  0xff   : > { %2496 = vmatpush1.bf16.msra.mxu1 %v2495_v19  ;;  %2426 = vmatprep.subr.bf16.mxu0 %v2425_v34  ;;  %v882_v13 = vld [vmem:[#allocation10 + $0x198] sm:$0xff]  ;;  %v2435_v16 = vpack.c.bf16 %v684_v6, %v682_v5  ;;  %v3695_v17 = vld [vmem:[%s3640_s27 + $0x40] sm:$0xff]  ;;  %v3701_v19 = vld [vmem:[%s3640_s27 + $0x50] sm:$0xff] }
 0x100   : > { %2498 = vmatprep.subr.bf16.mxu1 %v2497_v24  ;;  %v3692_v14 = vld [vmem:[%s3640_s27 + $0x48] sm:$0xff]  ;;  %v3698_v18 = vld [vmem:[%s3640_s27 + $0x58] sm:$0xff]  ;;  %v879_v20 = vld [vmem:[#allocation10 + $0x180] sm:$0xff]  ;;  %v2563_v25 = vpack.c.bf16 %v3701_v19, %v3695_v17  ;;  %v2513_v26 = vpack.c.bf16 %v882_v13, %v880_v12 }
 0x101   : > { %v686_v22 = vld [vmem:[#allocation9 + $0x120] sm:$0xff]  ;;  %v688_v23 = vld [vmem:[#allocation9 + $0x130] sm:$0xff]  ;;  %v2561_v24 = vpack.c.bf16 %v3698_v18, %v3692_v14  ;;  %v691_v28 = vld [vmem:[#allocation9 + $0x148] sm:$0xff] }
 0x102   : > { %2428 = vmatpush1.bf16.msra.mxu0 %v2427_v46  ;;  %v881_v27 = vld [vmem:[#allocation10 + $0x190] sm:$0xff]  ;;  %v693_v29 = vld [vmem:[#allocation9 + $0x158] sm:$0xff]  ;;  %v884_v30 = vld [vmem:[#allocation10 + $0x1a8] sm:$0xff]  ;;  %v2439_v32 = vpack.c.bf16 %v688_v23, %v686_v22 }
 0x103   : > { %2500 = vmatpush1.bf16.msra.mxu1 %v2499_v33  ;;  %2430 = vmatprep.subr.bf16.mxu0 %v2429_v51  ;;  %v886_v31 = vld [vmem:[#allocation10 + $0x1b8] sm:$0xff]  ;;  %v2515_v34 = vpack.c.bf16 %v881_v27, %v879_v20  ;;  %v883_v35 = vld [vmem:[#allocation10 + $0x1a0] sm:$0xff]  ;;  %v2441_v36 = vpack.c.bf16 %v693_v29, %v691_v28  ;;  %v885_v42 = vld [vmem:[#allocation10 + $0x1b0] sm:$0xff] }
 0x104   : > { %2502 = vmatprep.subr.bf16.mxu1 %v2501_v38  ;;  %v627_v33 = vld [vmem:[%s3632_s29 + $0x8] sm:$0xff]  ;;  %v690_v37 = vld [vmem:[#allocation9 + $0x140] sm:$0xff]  ;;  %v692_v38 = vld [vmem:[#allocation9 + $0x150] sm:$0xff]  ;;  %v2517_v39 = vpack.c.bf16 %v886_v31, %v884_v30  ;;  %v2519_v51 = vpack.c.bf16 %v885_v42, %v883_v35 }
 0x105   : > { %v695_v43 = vld [vmem:[#allocation9 + $0x168] sm:$0xff]  ;;  %v697_v45 = vld [vmem:[#allocation9 + $0x178] sm:$0xff]  ;;  %790 = vmatprep.mubr.f32.mxu0 %v627_v33  ;;  %v2443_v50 = vpack.c.bf16 %v692_v38, %v690_v37  ;;  %v887_v52 = vld [vmem:[#allocation10 + $0x1c0] sm:$0xff] }
 0x106   : > { %2432 = vmatpush1.bf16.msra.mxu0 %v2431_v63  ;;  %v888_v46 = vld [vmem:[#allocation10 + $0x1c8] sm:$0xff]  ;;  %v2445_v53 = vpack.c.bf16 %v697_v45, %v695_v43  ;;  %v696_v56 = vld [vmem:[#allocation9 + $0x170] sm:$0xff]  ;;  %v701_v60 = vld [vmem:[#allocation9 + $0x198] sm:$0xff] }
 0x107   : > { %2504 = vmatpush1.bf16.msra.mxu1 %v2503_v49  ;;  %2434 = vmatprep.subr.bf16.mxu0 %v2433_v4  ;;  %v890_v49 = vld [vmem:[#allocation10 + $0x1d8] sm:$0xff]  ;;  %v889_v58 = vld [vmem:[#allocation10 + $0x1d0] sm:$0xff]  ;;  %v699_v59 = vld [vmem:[#allocation9 + $0x188] sm:$0xff] }
 0x108   : > { %2506 = vmatprep.subr.bf16.mxu1 %v2505_v55  ;;  %v694_v55 = vld [vmem:[#allocation9 + $0x160] sm:$0xff]  ;;  %v2521_v57 = vpack.c.bf16 %v890_v49, %v888_v46  ;;  %v894_v63 = vld [vmem:[#allocation10 + $0x1f8] sm:$0xff]  ;;  %v2523_v4 = vpack.c.bf16 %v889_v58, %v887_v52  ;;  %v2449_v6 = vpack.c.bf16 %v701_v60, %v699_v59  ;;  %v700_v10 = vld [vmem:[#allocation9 + $0x190] sm:$0xff] }
 0x109   : > { %v2447_v3 = vpack.c.bf16 %v696_v56, %v694_v55  ;;  %v891_v5 = vld [vmem:[#allocation10 + $0x1e0] sm:$0xff]  ;;  %v893_v12 = vld [vmem:[#allocation10 + $0x1f0] sm:$0xff]  ;;  %v703_v13 = vld [vmem:[#allocation9 + $0x1a8] sm:$0xff]  ;;  %v716_v56 = vlaneseq }
 0x10a   : > { %2436 = vmatpush1.bf16.msra.mxu0 %v2435_v16  ;;  %v2527_v20 = vpack.c.bf16 %v893_v12, %v891_v5  ;;  %v702_v22 = vld [vmem:[#allocation9 + $0x1a0] sm:$0xff]  ;;  %v704_v23 = vld [vmem:[#allocation9 + $0x1b0] sm:$0xff]  ;;  %v709_v27 = vld [vmem:[#allocation9 + $0x1d8] sm:$0xff] }
 0x10b   : > { %2508 = vmatpush1.bf16.msra.mxu1 %v2507_v62  ;;  %2438 = vmatprep.subr.bf16.mxu0 %v2437_v21  ;;  %v892_v62 = vld [vmem:[#allocation10 + $0x1e8] sm:$0xff]  ;;  %v2455_v28 = vpack.c.bf16 %v704_v23, %v702_v22  ;;  %v706_v30 = vld [vmem:[#allocation9 + $0x1c0] sm:$0xff]  ;;  %v708_v31 = vld [vmem:[#allocation9 + $0x1d0] sm:$0xff] }
 0x10c   : > { %2510 = vmatprep.subr.bf16.mxu1 %v2509_v9  ;;  %v698_v9 = vld [vmem:[#allocation9 + $0x180] sm:$0xff]  ;;  %v2525_v11 = vpack.c.bf16 %v894_v63, %v892_v62  ;;  %v713_v33 = vld [vmem:[#allocation9 + $0x1f8] sm:$0xff]  ;;  %v712_v37 = vld [vmem:[#allocation9 + $0x1f0] sm:$0xff] }
 0x10d   : > { %v2451_v16 = vpack.c.bf16 %v700_v10, %v698_v9  ;;  %v629_v42 = vld [vmem:[%s3632_s29 + $0x18] sm:$0xff]  ;;  %v628_v43 = vld [vmem:[%s3632_s29 + $0x10] sm:$0xff]  ;;  %v631_v45 = vld [vmem:[%s3632_s29 + $0x28] sm:$0xff]  ;;  %v3263_v10 = vmov 0  }
 0x10e   : > { %2440 = vmatpush1.bf16.msra.mxu0 %v2439_v32  ;;  %v711_v32 = vld [vmem:[#allocation9 + $0x1e8] sm:$0xff]  ;;  %v630_v46 = vld [vmem:[%s3632_s29 + $0x20] sm:$0xff]  ;;  %v1016_v60 = vld [vmem:[%s4062_s5] sm:$0x3]  ;;  %2828 = vset.pattern.permute.xlu0 %v3263_v10 }
 0x10f   : > { %2512 = vmatpush1.bf16.msra.mxu1 %v2511_v15  ;;  %2442 = vmatprep.subr.bf16.mxu0 %v2441_v36  ;;  %v705_v15 = vld [vmem:[#allocation9 + $0x1b8] sm:$0xff]  ;;  %v2461_v35 = vpack.c.bf16 %v713_v33, %v711_v32  ;;  %v710_v36 = vld [vmem:[#allocation9 + $0x1e0] sm:$0xff] }
 0x110   : > { %2514 = vmatprep.subr.bf16.mxu1 %v2513_v26  ;;  %v2453_v21 = vpack.c.bf16 %v705_v15, %v703_v13  ;;  %v707_v26 = vld [vmem:[#allocation9 + $0x1c8] sm:$0xff]  ;;  %v2463_v38 = vpack.c.bf16 %v712_v37, %v710_v36  ;;  %v3731_v52 = vld [vmem:[%s3640_s27 + $0x60] sm:$0xff]  ;;  %v3749_v5 = vld [vmem:[%s4063_s6] sm:$0x3] }
 0x111   : > { %v2457_v29 = vpack.c.bf16 %v709_v27, %v707_v26  ;;  %v633_v49 = vld [vmem:[%s3632_s29 + $0x38] sm:$0xff]  ;;  %v634_v55 = vld [vmem:[%s3632_s29 + $0x40] sm:$0xff] }
 0x112   : > { %2444 = vmatpush1.bf16.msra.mxu0 %v2443_v50  ;;  %v3725_v50 = vld [vmem:[%s3640_s27 + $0x68] sm:$0xff]  ;;  %s2205_s27 = sshll.u32 %s3901_s12, 4  ;;  %s3966_s27 = int_to_ptr.vmem [resolvable:$true] %s2205_s27 }
 0x113   : > { %2516 = vmatpush1.bf16.msra.mxu1 %v2515_v34  ;;  %2446 = vmatprep.subr.bf16.mxu0 %v2445_v53  ;;  %v2459_v34 = vpack.c.bf16 %v708_v31, %v706_v30  ;;  %v635_v53 = vld [vmem:[%s3632_s29 + $0x48] sm:$0xff]  ;;  %s3139_s20 = scalar_lea.vmem %s3966_s27, 1280 }
 0x114   : > { %2518 = vmatprep.subr.bf16.mxu1 %v2517_v39  ;;  %v626_v39 = vld [vmem:[%s3632_s29] sm:$0xff]  ;;  %v2385_v9 = vld [vmem:[#allocation2] ss:$0 sm:$0xff]  ;;  %p3140_p0 = scmp.ne.s32.totalorder %s3966_s27, %s3139_s20 }
 0x115   : > { %1227 = vperm.xlu0 %2828, %v2385_v9  }
 0x116   : > { %2448 = vmatpush1.bf16.msra.mxu0 %v2447_v3  ;;  %p3141_p4 = pnand %p3140_p0, %p3526_p10 }
 0x117   : > { %2520 = vmatpush1.bf16.msra.mxu1 %v2519_v51  ;;  %2450 = vmatprep.subr.bf16.mxu0 %v2449_v6  ;;  %v632_v51 = vld [vmem:[%s3632_s29 + $0x30] sm:$0xff] }
 0x118   : > { %2522 = vmatprep.subr.bf16.mxu1 %v2521_v57  ;;  %v717_v57 = vshrl.u32 %v716_v56, 7  ;;  %p3142_p6 = pneg %p3141_p4 }
 0x11a   : > { %2452 = vmatpush1.bf16.msra.mxu0 %v2451_v16  ;;  %v3737_v58 = vsub.s32 1, %v717_v57  ;;  %v3739_v59 = vsub.s32 0, %v717_v57  ;;  %v714_v16 = vld [vmem:[%s4060_s3] sm:$0x3] }
 0x11b   : > { %2524 = vmatpush1.bf16.msra.mxu1 %v2523_v4  ;;  %2454 = vmatprep.subr.bf16.mxu0 %v2453_v21 }
 0x11c   : > { %2526 = vmatprep.subr.bf16.mxu1 %v2525_v11  ;;  %v1025_v62 = vrot.slane %v1016_v60, %v3737_v58  ;;  %v1021_v63 = vrot.slane %v1016_v60, %v3739_v59  ;;  %v3753_v6 = vrot.slane %v3749_v5, %v3737_v58  ;;  %v3760_v21 = vrot.slane %v714_v16, %v3739_v59 }
 0x11d   : > { %v3763_v23 = vrot.slane %v714_v16, %v3737_v58 }
 0x11e   : > { %2456 = vmatpush1.bf16.msra.mxu0 %v2455_v28  ;;  %v2541_v3 = vpack.c.bf16 %v1025_v62, %v1025_v62  ;;  %v2543_v4 = vpack.c.bf16 %v1021_v63, %v1021_v63 }
 0x11f   : > { %2528 = vmatpush1.bf16.msra.mxu1 %v2527_v20  ;;  %2458 = vmatprep.subr.bf16.mxu0 %v2457_v29 }
 0x120   : > { %2542 = vmatprep.subr.bf16.mxu1 %v2541_v3 }
 0x122   : > { %960 = vmatmul.mubr.f32.vlgmr.msra.gmra.mrb[0].mxu1 %v3668_v47  ;;  %2460 = vmatpush1.bf16.msra.mxu0 %v2459_v34 }
 0x123   : > { %965 = vmatprep.mubr.f32.mxu1 %v3662_v41  ;;  %2462 = vmatprep.subr.bf16.mxu0 %v2461_v35 }
 0x126   : > { %966 = vmatmul.mubr.f32.gmra.mrb[2].mxu1 %v3671_v48  ;;  %2464 = vmatpush1.bf16.msra.mxu0 %v2463_v38 }
 0x127   : > { %971 = vmatprep.mubr.f32.mxu1 %v3676_v61 }
 0x128   : > { %2544 = vmatpush1.bf16.xpose.msra.mxu1 %v2543_v4 }
 0x129   : > { %791 = vmatmul.mubr.f32.vlgmr.msra.gmra.mrb[0].mxu0 %v626_v39  ;;  %2546 = vmatprep.subr.bf16.mxu1 %v2541_v3 }
 0x12a   : > { %972 = vmatmul.mubr.f32.gmra.mrb[4].mxu1 %v3679_v0  ;;  %796 = vmatprep.mubr.f32.mxu0 %v629_v42 }
 0x12b   : > { %977 = vmatprep.mubr.f32.mxu1 %v3682_v1 }
 0x12d   : > { %797 = vmatmul.mubr.f32.gmra.mrb[2].mxu0 %v628_v43 }
 0x12e   : > { %978 = vmatmul.mubr.f32.gmra.mrb[6].mxu1 %v3685_v2  ;;  %802 = vmatprep.mubr.f32.mxu0 %v631_v45  ;;  %v3802_v2 = vand.u32 127, %v716_v56 }
 0x12f   : > { %983 = vmatprep.mubr.f32.mxu1 %v3692_v14 }
 0x130   : > { %2548 = vmatpush1.bf16.xpose.msra.mxu1 %v2543_v4  ;;  %vm1237_vm0 = vcmp.lt.s32.totalorder %v3802_v2, 49  ;;  %vm1988_vm2 = vcmp.lt.s32.totalorder %v3802_v2, 35 }
 0x131   : > { %803 = vmatmul.mubr.f32.gmra.mrb[4].mxu0 %v630_v46  ;;  %2550 = vmatprep.subr.bf16.mxu1 %v2541_v3 }
 0x132   : > { %984 = vmatmul.mubr.f32.gmra.mrb[8].mxu1 %v3695_v17  ;;  %808 = vmatprep.mubr.f32.mxu0 %v633_v49 }
 0x133   : > { %989 = vmatprep.mubr.f32.mxu1 %v3698_v18 }
 0x135   : > { %809 = vmatmul.mubr.f32.gmra.mrb[6].mxu0 %v632_v51 }
 0x136   : > { %990 = vmatmul.mubr.f32.gmra.mrb[10].mxu1 %v3701_v19  ;;  %814 = vmatprep.mubr.f32.mxu0 %v635_v53 }
 0x137   : > { %995 = vmatprep.mubr.f32.mxu1 %v3725_v50 }
 0x138   : > { %2552 = vmatpush1.bf16.xpose.msra.mxu1 %v2543_v4 }
 0x139   : > { %815 = vmatmul.mubr.f32.gmra.mrb[8].mxu0 %v634_v55  ;;  %1142 = vmatprep.subr.mxu1 %v1025_v62 }
 0x13a   : > { %996 = vmatmul.mubr.f32.gmra.mrb[12].mxu1 %v3731_v52  ;;  %1104 = vmatprep.mubr.f32.mxu0 %v3753_v6 }
 0x140   : > { %1143 = vmatpush1.xpose.msra.mxu1 %v1021_v63 }
 0x194   : > { %v1228_v14 = vpop.permute.xlu0 %1227 }
 0x1f5   : > { %v961_v11 = vpop.f32.mrb[0].mxu1 }
 0x1f6   : > { %v963_v12 = vpop.f32.mrb[1].mxu1  ;;  %2829 = vtanh.f32 %v961_v11 }
 0x1f7   : > { %2831 = vtanh.f32 %v963_v12 }
 0x1f9   : > { %v967_v13 = vpop.f32.mrb[2].mxu1 }
 0x1fa   : > { %2833 = vtanh.f32 %v967_v13  ;;  %v969_v15 = vpop.f32.mrb[3].mxu1 }
 0x1fb   : > { %2835 = vtanh.f32 %v969_v15 }
 0x1fc   : > { %v792_v26 = vpop.f32.mrb[0].mxu0 }
 0x1fd   : > { %v973_v20 = vpop.f32.mrb[4].mxu1  ;;  %v793_v28 = vadd.f32 %v792_v26, %v3760_v21  ;;  %v794_v29 = vpop.f32.mrb[1].mxu0 }
 0x1fe   : > { %v975_v22 = vpop.f32.mrb[5].mxu1  ;;  %2837 = vtanh.f32 %v973_v20  ;;  %v795_v32 = vadd.f32 %v794_v29, %v3763_v23 }
 0x1ff   : > { %2839 = vtanh.f32 %v975_v22 }
 0x200   : > { %v2830_v30 = vpop.eup %2829  ;;  %v798_v35 = vpop.f32.mrb[2].mxu0 }
 0x201   : > { %v979_v27 = vpop.f32.mrb[6].mxu1  ;;  %v2832_v33 = vpop.eup %2831  ;;  %v799_v39 = vadd.f32 %v798_v35, %v3760_v21 }
 0x202   : > { %2841 = vtanh.f32 %v979_v27  ;;  %v981_v31 = vpop.f32.mrb[7].mxu1  ;;  %v800_v42 = vpop.f32.mrb[3].mxu0 }
 0x203   : > { %2843 = vtanh.f32 %v981_v31  ;;  %v801_v46 = vadd.f32 %v800_v42, %v3763_v23 }
 0x204   : > { %v2834_v34 = vpop.eup %2833  ;;  %2845 = vtanh.f32 %v793_v28  ;;  %v804_v49 = vpop.f32.mrb[4].mxu0 }
 0x205   : > { %v2836_v36 = vpop.eup %2835  ;;  %v985_v37 = vpop.f32.mrb[8].mxu1  ;;  %v2531_v38 = vpack.c.bf16 %v2834_v34, %v2830_v30  ;;  %2847 = vtanh.f32 %v795_v32  ;;  %v805_v53 = vadd.f32 %v804_v49, %v3760_v21 }
 0x206   : > { %2849 = vtanh.f32 %v985_v37  ;;  %v987_v43 = vpop.f32.mrb[9].mxu1  ;;  %v2529_v45 = vpack.c.bf16 %v2836_v36, %v2832_v33  ;;  %v806_v55 = vpop.f32.mrb[5].mxu0 }
 0x207   : > { %2851 = vtanh.f32 %v987_v43  ;;  %v807_v62 = vadd.f32 %v806_v55, %v3763_v23 }
 0x208   : > { %2530 = vmatprep.subr.bf16.mxu0 %v2529_v45  ;;  %2853 = vtanh.f32 %v799_v39  ;;  %v2838_v57 = vpop.eup %2837  ;;  %v810_v4 = vpop.f32.mrb[6].mxu0 }
 0x209   : > { %v991_v51 = vpop.f32.mrb[10].mxu1  ;;  %2532 = vmatpush1.bf16.xpose.msra.mxu0 %v2531_v38  ;;  %2855 = vtanh.f32 %v801_v46  ;;  %v2840_v63 = vpop.eup %2839  ;;  %v811_v12 = vadd.f32 %v810_v4, %v3760_v21 }
 0x20a   : > { %2857 = vtanh.f32 %v991_v51  ;;  %v993_v60 = vpop.f32.mrb[11].mxu1  ;;  %v812_v13 = vpop.f32.mrb[7].mxu0  ;;  %v1033_v51 = vrot.slane %v3749_v5, %v3739_v59 }
 0x20b   : > { %2859 = vtanh.f32 %v993_v60  ;;  %v813_v22 = vadd.f32 %v812_v13, %v3763_v23 }
 0x20c   : > { %v2842_v3 = vpop.eup %2841  ;;  %2861 = vtanh.f32 %v805_v53  ;;  %v816_v28 = vpop.f32.mrb[8].mxu0 }
 0x20d   : > { %v2844_v9 = vpop.eup %2843  ;;  %v2535_v10 = vpack.c.bf16 %v2842_v3, %v2838_v57  ;;  %v997_v11 = vpop.f32.mrb[12].mxu1  ;;  %2863 = vtanh.f32 %v807_v62  ;;  %v817_v30 = vadd.f32 %v816_v28, %v3760_v21  ;;  %v2391_v28 = vld [vmem:[#allocation3] ss:$0 sm:$0xff] }
 0x20e   : > { %v2846_v15 = vpop.eup %2845  ;;  %v2533_v16 = vpack.c.bf16 %v2844_v9, %v2840_v63  ;;  %v999_v20 = vpop.f32.mrb[13].mxu1 }
 0x20f   : > { %v2848_v26 = vpop.eup %2847  ;;  %2865 = vtanh.f32 %v999_v20  ;;  %v818_v31 = vpop.f32.mrb[9].mxu0 }
 0x210   : > { %v2850_v27 = vpop.eup %2849  ;;  %2534 = vmatprep.subr.bf16.mxu0 %v2533_v16  ;;  %2867 = vtanh.f32 %v811_v12  ;;  %1194 = vmatprep.mubr.f32.mxu1 %v2848_v26  ;;  %v819_v33 = vadd.f32 %v818_v31, %v3763_v23 }
 0x211   : > { %v2852_v29 = vpop.eup %2851  ;;  %2536 = vmatpush1.bf16.xpose.msra.mxu0 %v2535_v10  ;;  %2869 = vtanh.f32 %v813_v22  ;;  %1195 = vmatmul.mubr.f32.vlgmr.msra.gmra.mrb[14].mxu1 %v2846_v15 }
 0x212   : > { %v2854_v32 = vpop.eup %2853  ;;  %2871 = vtanh.f32 %v817_v30 }
 0x213   : > { %v2856_v34 = vpop.eup %2855  ;;  %2873 = vtanh.f32 %v819_v33 }
 0x214   : > { %v2858_v35 = vpop.eup %2857  ;;  %1199 = vmatprep.mubr.f32.mxu1 %v2856_v34  ;;  %2875 = vtanh.f32 %v997_v11 }
 0x215   : > { %v2860_v36 = vpop.eup %2859  ;;  %v2539_v37 = vpack.c.bf16 %v2858_v35, %v2850_v27  ;;  %1200 = vmatmul.mubr.f32.gmra.mrb[16].mxu1 %v2854_v32 }
 0x216   : > { %v2862_v38 = vpop.eup %2861  ;;  %v2537_v39 = vpack.c.bf16 %v2860_v36, %v2852_v29 }
 0x217   : > { %v2864_v42 = vpop.eup %2863 }
 0x218   : > { %2538 = vmatprep.subr.bf16.mxu0 %v2537_v39  ;;  %1204 = vmatprep.mubr.f32.mxu1 %v2864_v42 }
 0x219   : > { %v2866_v21 = vpop.eup %2865  ;;  %2540 = vmatpush1.bf16.xpose.msra.mxu0 %v2539_v37  ;;  %1205 = vmatmul.mubr.f32.gmra.mrb[18].mxu1 %v2862_v38 }
 0x21a   : > { %v2868_v43 = vpop.eup %2867  ;;  %1052 = vmatprep.subr.mxu0 %v2866_v21 }
 0x21b   : > { %v2870_v23 = vpop.eup %2869 }
 0x21c   : > { %1209 = vmatprep.mubr.f32.mxu1 %v2870_v23  ;;  %v2872_v45 = vpop.eup %2871 }
 0x21d   : > { %1210 = vmatmul.mubr.f32.gmra.mrb[20].mxu1 %v2868_v43  ;;  %v2874_v46 = vpop.eup %2873 }
 0x21e   : > { %1214 = vmatprep.mubr.f32.mxu1 %v2874_v46  ;;  %v2876_v49 = vpop.eup %2875 }
 0x221   : > { %1053 = vmatpush1.xpose.msra.mxu0 %v2876_v49  ;;  %1215 = vmatmul.mubr.f32.gmra.mrb[22].mxu1 %v2872_v45 }
 0x222   : > { %2554 = vmatprep.subr.bf16.mxu0 %v2553_v44 }
 0x224   : > { %1105 = vmatmul.mubr.f32.vlgmr.msra.gmra.mrb[10].mxu0 %v1033_v51 }
 0x225   : > { %1109 = vmatprep.mubr.f32.mxu0 %v3753_v6  ;;  %2556 = vmatpush1.bf16.msra.mxu0 %v2555_v54 }
 0x226   : > { %2558 = vmatprep.subr.bf16.mxu0 %v2557_v7 }
 0x228   : > { %1110 = vmatmul.mubr.f32.gmra.mrb[12].mxu0 %v1033_v51 }
 0x229   : > { %1114 = vmatprep.mubr.f32.mxu0 %v3753_v6  ;;  %2560 = vmatpush1.bf16.msra.mxu0 %v2559_v8 }
 0x22a   : > { %2562 = vmatprep.subr.bf16.mxu0 %v2561_v24 }
 0x22c   : > { %1115 = vmatmul.mubr.f32.gmra.mrb[14].mxu0 %v1033_v51 }
 0x22d   : > { %1119 = vmatprep.mubr.f32.mxu0 %v3753_v6  ;;  %2564 = vmatpush1.bf16.msra.mxu0 %v2563_v25 }
 0x22e   : > { %1326 = vmatprep.subr.mxu0 %v3725_v50 }
 0x230   : > { %1120 = vmatmul.mubr.f32.gmra.mrb[16].mxu0 %v1033_v51 }
 0x231   : > { %1124 = vmatprep.mubr.f32.mxu0 %v3753_v6  ;;  %1327 = vmatpush1.msra.mxu0 %v3731_v52 }
 0x234   : > { %1125 = vmatmul.mubr.f32.gmra.mrb[18].mxu0 %v1033_v51 }
 0x2e4   : > { %v1196_v40 = vpop.f32.mrb[14].mxu1 }
 0x2e5   : > { %v1198_v41 = vpop.f32.mrb[15].mxu1 }
 0x2e8   : > { %v1201_v44 = vpop.f32.mrb[16].mxu1 }
 0x2e9   : > { %v1203_v47 = vpop.f32.mrb[17].mxu1 }
 0x2ec   : > { %v1206_v48 = vpop.f32.mrb[18].mxu1 }
 0x2ed   : > { %v1208_v54 = vpop.f32.mrb[19].mxu1 }
 0x2f0   : > { %v1211_v61 = vpop.f32.mrb[20].mxu1 }
 0x2f1   : > { %v1213_v0 = vpop.f32.mrb[21].mxu1 }
 0x2f2   : > { %v1601_v0 = vld [vmem:[#allocation12 + $0x8] sm:$0xff] }
 0x2f4   : > { %v1216_v1 = vpop.f32.mrb[22].mxu1 }
 0x2f5   : > { %v1218_v7 = vpop.f32.mrb[23].mxu1 }
 0x2f7   : > { %v1106_v8 = vpop.f32.mrb[10].mxu0 }
 0x2f8   : > { %v1197_v17 = vadd.f32 %v1196_v40, %v1106_v8  ;;  %v1108_v18 = vpop.f32.mrb[11].mxu0  ;;  %v1420_v8 = vld [vmem:[#allocation13 + $0x8] sm:$0xff] }
 0x2fa   : > { %v1230_v19 = vadd.f32 %v1228_v14, %v1197_v17  ;;  %v1419_v17 = vld [vmem:[#allocation13] sm:$0xff] }
 0x2fb   : > { %v1111_v24 = vpop.f32.mrb[12].mxu0 }
 0x2fc   : > { %v1202_v25 = vadd.f32 %v1201_v44, %v1111_v24  ;;  %v1113_v50 = vpop.f32.mrb[13].mxu0  ;;  %v1238_v52 = vsel %vm1237_vm0, %v1230_v19, -1e+30  ;;  %v1421_v19 = vld [vmem:[#allocation13 + $0x10] sm:$0xff] }
 0x2fd   : > { %v1244_v5 = vsel %vm1243_vm1, %v1238_v52, -inf  ;;  %v2567_v24 = vpack.c.bf16 %v1421_v19, %v1419_v17  ;;  %v1426_v50 = vld [vmem:[#allocation13 + $0x38] sm:$0xff] }
 0x2fe   : > { %v1231_v6 = vadd.f32 %v1228_v14, %v1202_v25  ;;  %1245 = vmax.xlane.f32.xlu0 %v1244_v5  ;;  %v1424_v25 = vld [vmem:[#allocation13 + $0x28] sm:$0xff] }
 0x2ff   : > { %v1116_v56 = vpop.f32.mrb[14].mxu0  ;;  %v2569_v5 = vpack.c.bf16 %v1426_v50, %v1424_v25  ;;  %v1462_v25 = vld [vmem:[#allocation13 + $0x158] sm:$0xff]  ;;  %v1459_v50 = vld [vmem:[#allocation13 + $0x140] sm:$0xff] }
 0x300   : > { %v1207_v53 = vadd.f32 %v1206_v48, %v1116_v56  ;;  %v1118_v55 = vpop.f32.mrb[15].mxu0  ;;  %v1239_v57 = vsel %vm1237_vm0, %v1231_v6, -1e+30  ;;  %v1425_v6 = vld [vmem:[#allocation13 + $0x30] sm:$0xff] }
 0x301   : > { %v1247_v60 = vsel %vm1243_vm1, %v1239_v57, -inf  ;;  %v1430_v55 = vld [vmem:[#allocation13 + $0x58] sm:$0xff] }
 0x302   : > { %v1232_v62 = vadd.f32 %v1228_v14, %v1207_v53  ;;  %1248 = vmax.xlane.f32.xlu1 %v1247_v60  ;;  %v1428_v53 = vld [vmem:[#allocation13 + $0x48] sm:$0xff] }
 0x303   : > { %v1121_v63 = vpop.f32.mrb[16].mxu0  ;;  %v2573_v60 = vpack.c.bf16 %v1430_v55, %v1428_v53  ;;  %v1466_v53 = vld [vmem:[#allocation13 + $0x178] sm:$0xff]  ;;  %v1463_v55 = vld [vmem:[#allocation13 + $0x160] sm:$0xff] }
 0x304   : > { %v1212_v3 = vadd.f32 %v1211_v61, %v1121_v63  ;;  %v1123_v4 = vpop.f32.mrb[17].mxu0  ;;  %v1240_v9 = vsel %vm1237_vm0, %v1232_v62, -1e+30  ;;  %v3264_v61 = vmov 0.0   ;;  %v1429_v62 = vld [vmem:[#allocation13 + $0x50] sm:$0xff] }
 0x305   : > { %v1250_v10 = vsel %vm1243_vm1, %v1240_v9, -inf  ;;  %1378 = vmatprep.mubr.f32.mxu0 %v3264_v61  ;;  %v1434_v4 = vld [vmem:[#allocation13 + $0x78] sm:$0xff] }
 0x306   : > { %v1233_v11 = vadd.f32 %v1228_v14, %v1212_v3  ;;  %1251 = vmax.xlane.f32.xlu1 %v1250_v10  ;;  %v1432_v3 = vld [vmem:[#allocation13 + $0x68] sm:$0xff] }
 0x307   : > { %v1126_v12 = vpop.f32.mrb[18].mxu0  ;;  %v2577_v10 = vpack.c.bf16 %v1434_v4, %v1432_v3  ;;  %v1470_v3 = vld [vmem:[#allocation13 + $0x198] sm:$0xff]  ;;  %v1467_v4 = vld [vmem:[#allocation13 + $0x180] sm:$0xff] }
 0x308   : > { %v1217_v13 = vadd.f32 %v1216_v1, %v1126_v12  ;;  %v1128_v15 = vpop.f32.mrb[19].mxu0  ;;  %v1241_v16 = vsel %vm1237_vm0, %v1233_v11, -1e+30  ;;  %v1603_v1 = vld [vmem:[#allocation12 + $0x18] sm:$0xff]  ;;  %v1433_v11 = vld [vmem:[#allocation13 + $0x70] sm:$0xff] }
 0x309   : > { %v1253_v20 = vsel %vm1243_vm1, %v1241_v16, -inf  ;;  %v2629_v7 = vpack.c.bf16 %v1603_v1, %v1601_v0  ;;  %v1438_v15 = vld [vmem:[#allocation13 + $0x98] sm:$0xff]  ;;  %v1453_v0 = vld [vmem:[#allocation13 + $0x110] sm:$0xff] }
 0x30a   : > { %v1234_v22 = vadd.f32 %v1228_v14, %v1217_v13  ;;  %1254 = vmax.xlane.f32.xlu1 %v1253_v20  ;;  %v1422_v14 = vld [vmem:[#allocation13 + $0x18] sm:$0xff]  ;;  %v1436_v13 = vld [vmem:[#allocation13 + $0x88] sm:$0xff] }
 0x30b   : > { %2630 = vmatprep.subr.bf16.mxu0 %v2629_v7  ;;  %v2565_v18 = vpack.c.bf16 %v1422_v14, %v1420_v8  ;;  %v2581_v20 = vpack.c.bf16 %v1438_v15, %v1436_v13  ;;  %v1456_v7 = vld [vmem:[#allocation13 + $0x128] sm:$0xff]  ;;  %v1458_v8 = vld [vmem:[#allocation13 + $0x138] sm:$0xff]  ;;  %v1455_v14 = vld [vmem:[#allocation13 + $0x120] sm:$0xff] }
 0x30c   : > { %v1242_v26 = vsel %vm1237_vm0, %v1234_v22, -1e+30  ;;  %v1437_v22 = vld [vmem:[#allocation13 + $0x90] sm:$0xff]  ;;  %v2601_v17 = vpack.c.bf16 %v1458_v8, %v1456_v7 }
 0x30d   : > { %v1256_v27 = vsel %vm1243_vm1, %v1242_v26, -inf  ;;  %2566 = vmatprep.subr.bf16.mxu1 %v2565_v18  ;;  %v1457_v18 = vld [vmem:[#allocation13 + $0x130] sm:$0xff] }
 0x30e   : > { %1257 = vmax.xlane.f32.xlu1 %v1256_v27  ;;  %2568 = vmatpush1.bf16.msra.mxu1 %v2567_v24  ;;  %v1440_v27 = vld [vmem:[#allocation13 + $0xa8] sm:$0xff]  ;;  %v2603_v19 = vpack.c.bf16 %v1457_v18, %v1455_v14 }
 0x30f   : > { %2570 = vmatprep.subr.bf16.mxu1 %v2569_v5  ;;  %v1460_v24 = vld [vmem:[#allocation13 + $0x148] sm:$0xff]  ;;  %v1461_v5 = vld [vmem:[#allocation13 + $0x150] sm:$0xff] }
 0x314   : > { %1980 = vperm.xlu0 %2828, %v2391_v28   ;;  %v1442_v28 = vld [vmem:[#allocation13 + $0xb8] sm:$0xff] }
 0x38b   : > { %v1246_v29 = vpop.xlane.xlu0 %1245 }
 0x38c   : > { %v1259_v30 = vsub.f32 %v1238_v52, %v1246_v29  ;;  %v1423_v52 = vld [vmem:[#allocation13 + $0x20] sm:$0xff] }
 0x38d   : > { %v2571_v56 = vpack.c.bf16 %v1425_v6, %v1423_v52  ;;  %v1439_v29 = vld [vmem:[#allocation13 + $0xa0] sm:$0xff]  ;;  %v2605_v52 = vpack.c.bf16 %v1462_v25, %v1460_v24  ;;  %v2607_v6 = vpack.c.bf16 %v1461_v5, %v1459_v50  ;;  %v1613_v24 = vld [vmem:[#allocation12 + $0x68] sm:$0xff]  ;;  %v1615_v25 = vld [vmem:[#allocation12 + $0x78] sm:$0xff] }
 0x38e   : > { %v1264_v31 = vmul.f32 1.442695, %v1259_v30  ;;  %v2585_v30 = vpack.c.bf16 %v1442_v28, %v1440_v27 }
 0x38f   : > { %v1249_v32 = vpop.xlane.xlu1 %1248  ;;  %2572 = vmatpush1.bf16.msra.mxu1 %v2571_v56  ;;  %v1464_v56 = vld [vmem:[#allocation13 + $0x168] sm:$0xff] }
 0x390   : > { %2877 = vpow2.f32 %v1264_v31  ;;  %v1260_v33 = vsub.f32 %v1239_v57, %v1249_v32  ;;  %v1427_v57 = vld [vmem:[#allocation13 + $0x40] sm:$0xff]  ;;  %2574 = vmatprep.subr.bf16.mxu1 %v2573_v60  ;;  %v1441_v31 = vld [vmem:[#allocation13 + $0xb0] sm:$0xff] }
 0x391   : > { %v2575_v63 = vpack.c.bf16 %v1429_v62, %v1427_v57  ;;  %v2587_v32 = vpack.c.bf16 %v1441_v31, %v1439_v29  ;;  %v2609_v57 = vpack.c.bf16 %v1466_v53, %v1464_v56  ;;  %v1465_v60 = vld [vmem:[#allocation13 + $0x170] sm:$0xff]  ;;  %v1475_v29 = vld [vmem:[#allocation13 + $0x1c0] sm:$0xff]  ;;  %v1480_v31 = vld [vmem:[#allocation13 + $0x1e8] sm:$0xff] }
 0x392   : > { %v1266_v34 = vmul.f32 1.442695, %v1260_v33  ;;  %v1444_v33 = vld [vmem:[#allocation13 + $0xc8] sm:$0xff]  ;;  %v2611_v62 = vpack.c.bf16 %v1465_v60, %v1463_v55  ;;  %v1612_v56 = vld [vmem:[#allocation12 + $0x60] sm:$0xff]  ;;  %v1619_v55 = vld [vmem:[#allocation12 + $0x98] sm:$0xff] }
 0x393   : > { %v1252_v35 = vpop.xlane.xlu1 %1251  ;;  %2576 = vmatpush1.bf16.msra.mxu1 %v2575_v63  ;;  %v1468_v63 = vld [vmem:[#allocation13 + $0x188] sm:$0xff] }
 0x394   : > { %2879 = vpow2.f32 %v1266_v34  ;;  %v1261_v36 = vsub.f32 %v1240_v9, %v1252_v35  ;;  %v1431_v9 = vld [vmem:[#allocation13 + $0x60] sm:$0xff]  ;;  %2578 = vmatprep.subr.bf16.mxu1 %v2577_v10  ;;  %v1446_v34 = vld [vmem:[#allocation13 + $0xd8] sm:$0xff]  ;;  %v1469_v10 = vld [vmem:[#allocation13 + $0x190] sm:$0xff] }
 0x395   : > { %v2579_v12 = vpack.c.bf16 %v1433_v11, %v1431_v9  ;;  %v1443_v35 = vld [vmem:[#allocation13 + $0xc0] sm:$0xff]  ;;  %v2613_v9 = vpack.c.bf16 %v1470_v3, %v1468_v63  ;;  %v1472_v11 = vld [vmem:[#allocation13 + $0x1a8] sm:$0xff]  ;;  %v2615_v13 = vpack.c.bf16 %v1469_v10, %v1467_v4  ;;  %v1618_v4 = vld [vmem:[#allocation12 + $0x90] sm:$0xff] }
 0x396   : > { %v1268_v37 = vmul.f32 1.442695, %v1261_v36  ;;  %v2589_v36 = vpack.c.bf16 %v1446_v34, %v1444_v33  ;;  %v1617_v53 = vld [vmem:[#allocation12 + $0x88] sm:$0xff]  ;;  %v1616_v3 = vld [vmem:[#allocation12 + $0x80] sm:$0xff] }
 0x397   : > { %v1255_v38 = vpop.xlane.xlu1 %1254  ;;  %2580 = vmatpush1.bf16.msra.mxu1 %v2579_v12  ;;  %v1474_v12 = vld [vmem:[#allocation13 + $0x1b8] sm:$0xff]  ;;  %v2645_v63 = vpack.c.bf16 %v1619_v55, %v1617_v53 }
 0x398   : > { %2881 = vpow2.f32 %v1268_v37  ;;  %v1262_v39 = vsub.f32 %v1241_v16, %v1255_v38  ;;  %v1435_v16 = vld [vmem:[#allocation13 + $0x80] sm:$0xff]  ;;  %2582 = vmatprep.subr.bf16.mxu1 %v2581_v20  ;;  %v1445_v37 = vld [vmem:[#allocation13 + $0xd0] sm:$0xff]  ;;  %v2617_v15 = vpack.c.bf16 %v1474_v12, %v1472_v11  ;;  %v2647_v11 = vpack.c.bf16 %v1618_v4, %v1616_v3  ;;  %v1655_v53 = vld [vmem:[#allocation12 + $0x1b8] sm:$0xff] }
 0x399   : > { %v2591_v38 = vpack.c.bf16 %v1445_v37, %v1443_v35  ;;  %v1473_v20 = vld [vmem:[#allocation13 + $0x1b0] sm:$0xff]  ;;  %v1659_v3 = vld [vmem:[#allocation12 + $0x1d8] sm:$0xff] }
 0x39a   : > { %v3820_v42 = vpop.eup %2877  ;;  %v1270_v21 = vmul.f32 1.442695, %v1262_v39  ;;  %v1448_v39 = vld [vmem:[#allocation13 + $0xe8] sm:$0xff] }
 0x39b   : > { %v1258_v43 = vpop.xlane.xlu1 %1257  ;;  %v1274_v23 = vsel %vm1243_vm1, %v3820_v42, 0.0 }
 0x39c   : > { %2883 = vpow2.f32 %v1270_v21  ;;  %v1263_v45 = vsub.f32 %v1242_v26, %v1258_v43  ;;  %1275 = vadd.xlane.f32.xlu1 %v1274_v23  ;;  %v2583_v26 = vpack.c.bf16 %v1437_v22, %v1435_v16  ;;  %v1450_v21 = vld [vmem:[#allocation13 + $0xf8] sm:$0xff]  ;;  %v1447_v43 = vld [vmem:[#allocation13 + $0xe0] sm:$0xff]  ;;  %v1476_v22 = vld [vmem:[#allocation13 + $0x1c8] sm:$0xff] }
 0x39d   : > { %v2593_v23 = vpack.c.bf16 %v1450_v21, %v1448_v39  ;;  %v1471_v16 = vld [vmem:[#allocation13 + $0x1a0] sm:$0xff]  ;;  %v1602_v39 = vld [vmem:[#allocation12 + $0x10] sm:$0xff]  ;;  %v1605_v21 = vld [vmem:[#allocation12 + $0x28] sm:$0xff] }
 0x39e   : > { %v3824_v46 = vpop.eup %2879  ;;  %v1272_v49 = vmul.f32 1.442695, %v1263_v45  ;;  %2584 = vmatpush1.bf16.msra.mxu1 %v2583_v26  ;;  %v1449_v45 = vld [vmem:[#allocation13 + $0xf0] sm:$0xff]  ;;  %v1478_v26 = vld [vmem:[#allocation13 + $0x1d8] sm:$0xff]  ;;  %v2619_v27 = vpack.c.bf16 %v1473_v20, %v1471_v16  ;;  %v1625_v16 = vld [vmem:[#allocation12 + $0xc8] sm:$0xff] }
 0x39f   : > { %v1277_v51 = vsel %vm1243_vm1, %v3824_v46, 0.0  ;;  %2586 = vmatprep.subr.bf16.mxu1 %v2585_v30  ;;  %v2621_v28 = vpack.c.bf16 %v1478_v26, %v1476_v22  ;;  %v1477_v30 = vld [vmem:[#allocation13 + $0x1d0] sm:$0xff]  ;;  %v1627_v20 = vld [vmem:[#allocation12 + $0xd8] sm:$0xff] }
 0x3a0   : > { %2885 = vpow2.f32 %v1272_v49  ;;  %1278 = vadd.xlane.f32.xlu1 %v1277_v51  ;;  %v2595_v49 = vpack.c.bf16 %v1449_v45, %v1447_v43  ;;  %v1452_v51 = vld [vmem:[#allocation13 + $0x108] sm:$0xff]  ;;  %v2623_v33 = vpack.c.bf16 %v1477_v30, %v1475_v29  ;;  %v1607_v43 = vld [vmem:[#allocation12 + $0x38] sm:$0xff]  ;;  %v1626_v29 = vld [vmem:[#allocation12 + $0xd0] sm:$0xff] }
 0x3a1   : > { %v3856_v26 = vld [vmem:[%s3632_s29 + $0x8] sm:$0xff] }
 0x3a2   : > { %v3828_v40 = vpop.eup %2881  ;;  %2588 = vmatpush1.bf16.msra.mxu1 %v2587_v32  ;;  %v1482_v32 = vld [vmem:[#allocation13 + $0x1f8] sm:$0xff]  ;;  %v1629_v30 = vld [vmem:[#allocation12 + $0xe8] sm:$0xff] }
 0x3a3   : > { %v1280_v41 = vsel %vm1243_vm1, %v3828_v40, 0.0  ;;  %2590 = vmatprep.subr.bf16.mxu1 %v2589_v36  ;;  %v2625_v34 = vpack.c.bf16 %v1482_v32, %v1480_v31 }
 0x3a4   : > { %1281 = vadd.xlane.f32.xlu1 %v1280_v41  ;;  %v1454_v41 = vld [vmem:[#allocation13 + $0x118] sm:$0xff] }
 0x3a6   : > { %v3832_v44 = vpop.eup %2883  ;;  %2592 = vmatpush1.bf16.msra.mxu1 %v2591_v38  ;;  %v1600_v38 = vld [vmem:[#allocation12] sm:$0xff] }
 0x3a7   : > { %v1283_v47 = vsel %vm1243_vm1, %v3832_v44, 0.0  ;;  %2594 = vmatprep.subr.bf16.mxu1 %v2593_v23  ;;  %v2631_v45 = vpack.c.bf16 %v1602_v39, %v1600_v38  ;;  %v1632_v39 = vld [vmem:[#allocation12 + $0x100] sm:$0xff] }
 0x3a8   : > { %1284 = vadd.xlane.f32.xlu1 %v1283_v47  ;;  %v1451_v47 = vld [vmem:[#allocation13 + $0x100] sm:$0xff] }
 0x3a9   : > { %v2599_v1 = vpack.c.bf16 %v1453_v0, %v1451_v47  ;;  %v1604_v47 = vld [vmem:[#allocation12 + $0x20] sm:$0xff]  ;;  %v1609_v0 = vld [vmem:[#allocation12 + $0x48] sm:$0xff] }
 0x3aa   : > { %v3836_v48 = vpop.eup %2885  ;;  %2596 = vmatpush1.bf16.msra.mxu1 %v2595_v49 }
 0x3ab   : > { %v1286_v54 = vsel %vm1243_vm1, %v3836_v48, 0.0 }
 0x3ac   : > { %1287 = vadd.xlane.f32.xlu1 %v1286_v54  ;;  %v2597_v54 = vpack.c.bf16 %v1454_v41, %v1452_v51  ;;  %v2633_v41 = vpack.c.bf16 %v1607_v43, %v1605_v21  ;;  %v1634_v21 = vld [vmem:[#allocation12 + $0x110] sm:$0xff]  ;;  %v1637_v43 = vld [vmem:[#allocation12 + $0x128] sm:$0xff] }
 0x3ae   : > { %2598 = vmatprep.subr.bf16.mxu1 %v2597_v54  ;;  %v1606_v54 = vld [vmem:[#allocation12 + $0x30] sm:$0xff] }
 0x3af   : > { %2600 = vmatpush1.bf16.msra.mxu1 %v2599_v1  ;;  %v1611_v1 = vld [vmem:[#allocation12 + $0x58] sm:$0xff]  ;;  %v2635_v8 = vpack.c.bf16 %v1606_v54, %v1604_v47  ;;  %v1641_v47 = vld [vmem:[#allocation12 + $0x148] sm:$0xff] }
 0x3b0   : > { %2602 = vmatprep.subr.bf16.mxu1 %v2601_v17  ;;  %v2637_v18 = vpack.c.bf16 %v1611_v1, %v1609_v0  ;;  %v1643_v54 = vld [vmem:[#allocation12 + $0x158] sm:$0xff] }
 0x3b1   : > { %v2669_v1 = vpack.c.bf16 %v1643_v54, %v1641_v47 }
 0x3b3   : > { %2604 = vmatpush1.bf16.msra.mxu1 %v2603_v19  ;;  %v1610_v19 = vld [vmem:[#allocation12 + $0x50] sm:$0xff] }
 0x3b4   : > { %2606 = vmatprep.subr.bf16.mxu1 %v2605_v52 }
 0x3b7   : > { %2608 = vmatpush1.bf16.msra.mxu1 %v2607_v6  ;;  %v2641_v6 = vpack.c.bf16 %v1615_v25, %v1613_v24  ;;  %v1646_v24 = vld [vmem:[#allocation12 + $0x170] sm:$0xff]  ;;  %v1649_v25 = vld [vmem:[#allocation12 + $0x188] sm:$0xff] }
 0x3b8   : > { %2610 = vmatprep.subr.bf16.mxu1 %v2609_v57 }
 0x3bb   : > { %2612 = vmatpush1.bf16.msra.mxu1 %v2611_v62 }
 0x3bc   : > { %2614 = vmatprep.subr.bf16.mxu1 %v2613_v9  ;;  %v1623_v9 = vld [vmem:[#allocation12 + $0xb8] sm:$0xff] }
 0x3bf   : > { %2616 = vmatpush1.bf16.msra.mxu1 %v2615_v13 }
 0x3c0   : > { %2618 = vmatprep.subr.bf16.mxu1 %v2617_v15  ;;  %v1620_v15 = vld [vmem:[#allocation12 + $0xa0] sm:$0xff] }
 0x3c3   : > { %2620 = vmatpush1.bf16.msra.mxu1 %v2619_v27  ;;  %v2653_v27 = vpack.c.bf16 %v1627_v20, %v1625_v16  ;;  %v1662_v16 = vld [vmem:[#allocation12 + $0x1f0] sm:$0xff] }
 0x3c4   : > { %2622 = vmatprep.subr.bf16.mxu1 %v2621_v28  ;;  %v1624_v28 = vld [vmem:[#allocation12 + $0xc0] sm:$0xff] }
 0x3c5   : > { %v2655_v31 = vpack.c.bf16 %v1626_v29, %v1624_v28  ;;  %v3868_v28 = vld [vmem:[%s3632_s29 + $0x10] sm:$0xff]  ;;  %v3872_v29 = vld [vmem:[%s3632_s29 + $0x28] sm:$0xff] }
 0x3c7   : > { %2624 = vmatpush1.bf16.msra.mxu1 %v2623_v33  ;;  %v1628_v33 = vld [vmem:[#allocation12 + $0xe0] sm:$0xff] }
 0x3c8   : > { %2626 = vmatprep.subr.bf16.mxu1 %v2625_v34  ;;  %v1630_v34 = vld [vmem:[#allocation12 + $0xf0] sm:$0xff] }
 0x429   : > { %v1276_v35 = vpop.xlane.xlu1 %1275 }
 0x42a   : > { %2887 = vrcp.f32 %v1276_v35  ;;  %v1633_v35 = vld [vmem:[#allocation12 + $0x108] sm:$0xff] }
 0x42d   : > { %v1279_v36 = vpop.xlane.xlu1 %1278 }
 0x42e   : > { %2889 = vrcp.f32 %v1279_v36  ;;  %v1635_v36 = vld [vmem:[#allocation12 + $0x118] sm:$0xff] }
 0x42f   : > { %v2661_v38 = vpack.c.bf16 %v1635_v36, %v1633_v35  ;;  %v1481_v35 = vld [vmem:[#allocation13 + $0x1f0] sm:$0xff] }
 0x431   : > { %v1282_v37 = vpop.xlane.xlu1 %1281 }
 0x432   : > { %2891 = vrcp.f32 %v1282_v37  ;;  %v2659_v37 = vpack.c.bf16 %v1630_v34, %v1628_v33  ;;  %v3892_v33 = vld [vmem:[%s3632_s29 + $0x40] sm:$0xff] }
 0x433   : > { %v1479_v34 = vld [vmem:[#allocation13 + $0x1e0] sm:$0xff] }
 0x434   : > { %v2888_v23 = vpop.eup %2887  ;;  %v2627_v36 = vpack.c.bf16 %v1481_v35, %v1479_v34 }
 0x435   : > { %v1290_v49 = vmul.f32 %v2888_v23, %v3820_v42  ;;  %v1285_v51 = vpop.xlane.xlu1 %1284  ;;  %v1608_v42 = vld [vmem:[#allocation12 + $0x40] sm:$0xff]  ;;  %v1639_v23 = vld [vmem:[#allocation12 + $0x138] sm:$0xff] }
 0x436   : > { %2893 = vrcp.f32 %v1285_v51  ;;  %v2639_v52 = vpack.c.bf16 %v1610_v19, %v1608_v42  ;;  %v1636_v51 = vld [vmem:[#allocation12 + $0x120] sm:$0xff]  ;;  %2628 = vmatpush1.bf16.msra.mxu1 %v2627_v36 }
 0x437   : > { %2386 = vmatmul.mubr.msk.f32.vlgmr.msra.gmra.mrb[20].mxu0 %vm1243_vm1, %v1290_v49  ;;  %v2665_v49 = vpack.c.bf16 %v1639_v23, %v1637_v43  ;;  %v1644_v19 = vld [vmem:[#allocation12 + $0x160] sm:$0xff] }
 0x438   : > { %v2890_v7 = vpop.eup %2889  ;;  %1384 = vmatprep.mubr.f32.mxu0 %v3264_v61  ;;  %2632 = vmatpush1.bf16.msra.mxu0 %v2631_v45  ;;  %v2663_v45 = vpack.c.bf16 %v1634_v21, %v1632_v39 }
 0x439   : > { %v1288_v14 = vpop.xlane.xlu1 %1287  ;;  %v1292_v17 = vmul.f32 %v2890_v7, %v3824_v46  ;;  %2634 = vmatprep.subr.bf16.mxu0 %v2633_v41  ;;  %v1614_v46 = vld [vmem:[#allocation12 + $0x70] sm:$0xff]  ;;  %v1640_v7 = vld [vmem:[#allocation12 + $0x140] sm:$0xff] }
 0x43a   : > { %2895 = vrcp.f32 %v1288_v14  ;;  %v2643_v60 = vpack.c.bf16 %v1614_v46, %v1612_v56  ;;  %v1638_v41 = vld [vmem:[#allocation12 + $0x130] sm:$0xff]  ;;  %v1645_v14 = vld [vmem:[#allocation12 + $0x168] sm:$0xff] }
 0x43b   : > { %2387 = vmatmul.mubr.msk.f32.gmra.mrb[22].mxu0 %vm1243_vm1, %v1292_v17  ;;  %v2667_v0 = vpack.c.bf16 %v1638_v41, %v1636_v51  ;;  %v1647_v17 = vld [vmem:[#allocation12 + $0x178] sm:$0xff]  ;;  %v1650_v56 = vld [vmem:[#allocation12 + $0x190] sm:$0xff]  ;;  %v1653_v46 = vld [vmem:[#allocation12 + $0x1a8] sm:$0xff] }
 0x43c   : > { %v2892_v50 = vpop.eup %2891  ;;  %1390 = vmatprep.mubr.f32.mxu0 %v3264_v61  ;;  %2636 = vmatpush1.bf16.msra.mxu0 %v2635_v8  ;;  %v1642_v8 = vld [vmem:[#allocation12 + $0x150] sm:$0xff]  ;;  %v2673_v42 = vpack.c.bf16 %v1647_v17, %v1645_v14 }
 0x43d   : > { %v1294_v5 = vmul.f32 %v2892_v50, %v3828_v40  ;;  %2638 = vmatprep.subr.bf16.mxu0 %v2637_v18  ;;  %v1621_v40 = vld [vmem:[#allocation12 + $0xa8] sm:$0xff]  ;;  %v2671_v18 = vpack.c.bf16 %v1642_v8, %v1640_v7  ;;  %v1651_v50 = vld [vmem:[#allocation12 + $0x198] sm:$0xff] }
 0x43e   : > { %v2649_v13 = vpack.c.bf16 %v1623_v9, %v1621_v40  ;;  %v1656_v9 = vld [vmem:[#allocation12 + $0x1c0] sm:$0xff] }
 0x43f   : > { %2388 = vmatmul.mubr.msk.f32.gmra.mrb[24].mxu0 %vm1243_vm1, %v1294_v5  ;;  %v2677_v5 = vpack.c.bf16 %v1651_v50, %v1649_v25 }
 0x440   : > { %v2894_v57 = vpop.eup %2893  ;;  %1396 = vmatprep.mubr.f32.mxu0 %v3264_v61  ;;  %2640 = vmatpush1.bf16.msra.mxu0 %v2639_v52  ;;  %v2675_v52 = vpack.c.bf16 %v1646_v24, %v1644_v19 }
 0x441   : > { %v1296_v62 = vmul.f32 %v2894_v57, %v3832_v44  ;;  %2642 = vmatprep.subr.bf16.mxu0 %v2641_v6  ;;  %v1622_v44 = vld [vmem:[#allocation12 + $0xb0] sm:$0xff]  ;;  %v1648_v6 = vld [vmem:[#allocation12 + $0x180] sm:$0xff]  ;;  %v2681_v57 = vpack.c.bf16 %v1655_v53, %v1653_v46 }
 0x442   : > { %v2651_v22 = vpack.c.bf16 %v1622_v44, %v1620_v15  ;;  %v2679_v55 = vpack.c.bf16 %v1650_v56, %v1648_v6  ;;  %v1660_v44 = vld [vmem:[#allocation12 + $0x1e0] sm:$0xff] }
 0x443   : > { %2389 = vmatmul.mubr.msk.f32.gmra.mrb[26].mxu0 %vm1243_vm1, %v1296_v62  ;;  %v1654_v62 = vld [vmem:[#allocation12 + $0x1b0] sm:$0xff]  ;;  %v2691_v20 = vpack.c.bf16 %v1662_v16, %v1660_v44 }
 0x444   : > { %v2896_v10 = vpop.eup %2895  ;;  %1402 = vmatprep.mubr.f32.mxu0 %v3264_v61  ;;  %2644 = vmatpush1.bf16.msra.mxu0 %v2643_v60  ;;  %v1652_v60 = vld [vmem:[#allocation12 + $0x1a0] sm:$0xff] }
 0x445   : > { %v1298_v12 = vmul.f32 %v2896_v10, %v3836_v48  ;;  %2646 = vmatprep.subr.bf16.mxu0 %v2645_v63  ;;  %v1631_v48 = vld [vmem:[#allocation12 + $0xf8] sm:$0xff]  ;;  %v1657_v63 = vld [vmem:[#allocation12 + $0x1c8] sm:$0xff]  ;;  %v2683_v4 = vpack.c.bf16 %v1654_v62, %v1652_v60  ;;  %v1658_v10 = vld [vmem:[#allocation12 + $0x1d0] sm:$0xff] }
 0x446   : > { %v2657_v32 = vpack.c.bf16 %v1631_v48, %v1629_v30  ;;  %v2685_v40 = vpack.c.bf16 %v1659_v3, %v1657_v63  ;;  %v3876_v30 = vld [vmem:[%s3632_s29 + $0x20] sm:$0xff]  ;;  %v3880_v48 = vld [vmem:[%s3632_s29 + $0x38] sm:$0xff] }
 0x447   : > { %2390 = vmatmul.mubr.msk.f32.gmra.mrb[28].mxu0 %vm1243_vm1, %v1298_v12  ;;  %v1663_v12 = vld [vmem:[#allocation12 + $0x1f8] sm:$0xff] }
 0x448   : > { %2648 = vmatpush1.bf16.msra.mxu0 %v2647_v11  ;;  %1728 = vmatprep.mubr.f32.mxu0 %v3856_v26  ;;  %v1661_v11 = vld [vmem:[#allocation12 + $0x1e8] sm:$0xff] }
 0x449   : > { %2650 = vmatprep.subr.bf16.mxu0 %v2649_v13  ;;  %v2687_v13 = vpack.c.bf16 %v1658_v10, %v1656_v9  ;;  %v2689_v15 = vpack.c.bf16 %v1663_v12, %v1661_v11 }
 0x44c   : > { %2652 = vmatpush1.bf16.msra.mxu0 %v2651_v22  ;;  %v3860_v22 = vld [vmem:[%s3632_s29] sm:$0xff] }
 0x44d   : > { %2654 = vmatprep.subr.bf16.mxu0 %v2653_v27  ;;  %v3864_v27 = vld [vmem:[%s3632_s29 + $0x18] sm:$0xff] }
 0x450   : > { %2656 = vmatpush1.bf16.msra.mxu0 %v2655_v31  ;;  %v3884_v31 = vld [vmem:[%s3632_s29 + $0x30] sm:$0xff] }
 0x451   : > { %2658 = vmatprep.subr.bf16.mxu0 %v2657_v32  ;;  %v3888_v32 = vld [vmem:[%s3632_s29 + $0x48] sm:$0xff]  ;;  %s4119_s29 = sld [smem:[#allocation33_spill]] }
 0x454   : > { %2660 = vmatpush1.bf16.msra.mxu0 %v2659_v37  ;;  %v1769_v37 = vld [vmem:[%s4118_s17] sm:$0x3]  ;;  %s3143_s17 = sshll.u32 %s3265_s2, 4  ;;  %s3144_s17 = int_to_ptr.vmem [resolvable:$false] %s3143_s17 }
 0x455   : > { %2662 = vmatprep.subr.bf16.mxu0 %v2661_v38  ;;  %v1774_v38 = vrot.slane %v1769_v37, %v3739_v59  ;;  %v1778_v39 = vrot.slane %v1769_v37, %v3737_v58  ;;  %p3146_p3 = scmp.lt.s32.totalorder %s3966_s27, %s3144_s17 }
 0x457   : > { %v2701_v21 = vpack.c.bf16 %v1778_v39, %v1778_v39  ;;  %v2703_v43 = vpack.c.bf16 %v1774_v38, %v1774_v38  ;;  %v1781_v10 = vld [vmem:[%s4119_s29] sm:$0x3] }
 0x458   : > { %2664 = vmatpush1.bf16.msra.mxu0 %v2663_v45  ;;  %v1790_v11 = vrot.slane %v1781_v10, %v3737_v58  ;;  %v1786_v12 = vrot.slane %v1781_v10, %v3739_v59 }
 0x459   : > { %2666 = vmatprep.subr.bf16.mxu0 %v2665_v49 }
 0x45c   : > { %2668 = vmatpush1.bf16.msra.mxu0 %v2667_v0 }
 0x45d   : > { %2670 = vmatprep.subr.bf16.mxu0 %v2669_v1 }
 0x460   : > { %2672 = vmatpush1.bf16.msra.mxu0 %v2671_v18 }
 0x461   : > { %2674 = vmatprep.subr.bf16.mxu0 %v2673_v42 }
 0x464   : > { %2676 = vmatpush1.bf16.msra.mxu0 %v2675_v52 }
 0x465   : > { %2678 = vmatprep.subr.bf16.mxu0 %v2677_v5 }
 0x468   : > { %2680 = vmatpush1.bf16.msra.mxu0 %v2679_v55 }
 0x469   : > { %2682 = vmatprep.subr.bf16.mxu0 %v2681_v57 }
 0x46c   : > { %2684 = vmatpush1.bf16.msra.mxu0 %v2683_v4 }
 0x46d   : > { %2686 = vmatprep.subr.bf16.mxu0 %v2685_v40 }
 0x470   : > { %2688 = vmatpush1.bf16.msra.mxu0 %v2687_v13  ;;  %v1483_v13 = vld [vmem:[%s4120_s28] sm:$0x3] }
 0x471   : > { %2690 = vmatprep.subr.bf16.mxu0 %v2689_v15  ;;  %v1488_v15 = vrot.slane %v1483_v13, %v3739_v59  ;;  %v1492_v44 = vrot.slane %v1483_v13, %v3737_v58 }
 0x474   : > { %2692 = vmatpush1.bf16.msra.mxu0 %v2691_v20 }
 0x475   : > { %2702 = vmatprep.subr.bf16.mxu0 %v2701_v21 }
 0x477   : > { %1729 = vmatmul.mubr.f32.vlgmr.msra.gmra.mrb[30].mxu0 %v3860_v22 }
 0x478   : > { %1734 = vmatprep.mubr.f32.mxu0 %v3864_v27 }
 0x47b   : > { %1735 = vmatmul.mubr.f32.gmra.mrb[32].mxu0 %v3868_v28 }
 0x47c   : > { %1740 = vmatprep.mubr.f32.mxu0 %v3872_v29 }
 0x47d   : > { %2704 = vmatpush1.bf16.xpose.msra.mxu0 %v2703_v43 }
 0x47e   : > { %2706 = vmatprep.subr.bf16.mxu0 %v2701_v21 }
 0x47f   : > { %1741 = vmatmul.mubr.f32.gmra.mrb[34].mxu0 %v3876_v30 }
 0x480   : > { %1746 = vmatprep.mubr.f32.mxu0 %v3880_v48 }
 0x483   : > { %1747 = vmatmul.mubr.f32.gmra.mrb[36].mxu0 %v3884_v31 }
 0x484   : > { %1752 = vmatprep.mubr.f32.mxu0 %v3888_v32 }
 0x485   : > { %2708 = vmatpush1.bf16.xpose.msra.mxu0 %v2703_v43 }
 0x486   : > { %1891 = vmatprep.subr.mxu0 %v1778_v39 }
 0x487   : > { %1753 = vmatmul.mubr.f32.gmra.mrb[38].mxu0 %v3892_v33 }
 0x48d   : > { %1892 = vmatpush1.xpose.msra.mxu0 %v1774_v38 }
 0x50a   : > { %v1380_v23 = vpop.f32.mrb[20].mxu0 }
 0x50b   : > { %1409 = vst [vmem:[%s3901_s12] sm:$0xff] %v1380_v23  ;;  %v1382_v45 = vpop.f32.mrb[21].mxu0 }
 0x50c   : > { %1410 = vst [vmem:[%s3901_s12 + $0x8] sm:$0xff] %v1382_v45  ;;  %1559 = vmatprep.mubr.f32.mxu1 %v1382_v45 }
 0x50d   : > { %1560 = vmatmul.mubr.f32.vlgmr.msra.gmra.mrb[24].mxu1 %v1380_v23 }
 0x50e   : > { %v1386_v49 = vpop.f32.mrb[22].mxu0 }
 0x50f   : > { %1411 = vst [vmem:[%s3901_s12 + $0x10] sm:$0xff] %v1386_v49  ;;  %v1388_v51 = vpop.f32.mrb[23].mxu0 }
 0x510   : > { %1412 = vst [vmem:[%s3901_s12 + $0x18] sm:$0xff] %v1388_v51  ;;  %1565 = vmatprep.mubr.f32.mxu1 %v1388_v51 }
 0x511   : > { %1566 = vmatmul.mubr.f32.gmra.mrb[26].mxu1 %v1386_v49 }
 0x512   : > { %v1392_v41 = vpop.f32.mrb[24].mxu0 }
 0x513   : > { %1413 = vst [vmem:[%s3901_s12 + $0x20] sm:$0xff] %v1392_v41  ;;  %v1394_v47 = vpop.f32.mrb[25].mxu0 }
 0x514   : > { %1414 = vst [vmem:[%s3901_s12 + $0x28] sm:$0xff] %v1394_v47  ;;  %1571 = vmatprep.mubr.f32.mxu1 %v1394_v47 }
 0x515   : > { %1572 = vmatmul.mubr.f32.gmra.mrb[28].mxu1 %v1392_v41 }
 0x516   : > { %v1398_v54 = vpop.f32.mrb[26].mxu0 }
 0x517   : > { %1415 = vst [vmem:[%s3901_s12 + $0x30] sm:$0xff] %v1398_v54  ;;  %v1400_v0 = vpop.f32.mrb[27].mxu0 }
 0x518   : > { %1416 = vst [vmem:[%s3901_s12 + $0x38] sm:$0xff] %v1400_v0  ;;  %1577 = vmatprep.mubr.f32.mxu1 %v1400_v0 }
 0x519   : > { %1578 = vmatmul.mubr.f32.gmra.mrb[30].mxu1 %v1398_v54 }
 0x51a   : > { %v1404_v1 = vpop.f32.mrb[28].mxu0 }
 0x51b   : > { %1417 = vst [vmem:[%s3901_s12 + $0x40] sm:$0xff] %v1404_v1  ;;  %v1406_v7 = vpop.f32.mrb[29].mxu0 }
 0x51c   : > { %1418 = vst [vmem:[%s3901_s12 + $0x48] sm:$0xff] %v1406_v7  ;;  %1583 = vmatprep.mubr.f32.mxu1 %v1406_v7  ;;  %s3145_s12 = scalar_lea.vmem %s3144_s17, 2560 }
 0x51d   : > { %1584 = vmatmul.mubr.f32.gmra.mrb[32].mxu1 %v1404_v1  ;;  %p3147_p5 = scmp.lt.s32.totalorder %s3145_s12, %s3139_s20 }
 0x51e   : > { %1857 = vmatprep.mubr.f32.mxu1 %v1790_v11 }
 0x51f   : > { %p3148_p9 = por %p3147_p5, %p3146_p3 }
 0x521   : > { %p3149_p8 = pnand %p3148_p9, %p3142_p6 }
 0x54a   : > { %v1730_v8 = vpop.f32.mrb[30].mxu0 }
 0x54b   : > { %v1732_v14 = vpop.f32.mrb[31].mxu0  ;;  %2897 = vtanh.f32 %v1730_v8 }
 0x54c   : > { %2899 = vtanh.f32 %v1732_v14 }
 0x54e   : > { %v1736_v17 = vpop.f32.mrb[32].mxu0 }
 0x54f   : > { %2901 = vtanh.f32 %v1736_v17  ;;  %v1738_v18 = vpop.f32.mrb[33].mxu0 }
 0x550   : > { %2903 = vtanh.f32 %v1738_v18 }
 0x552   : > { %v1742_v42 = vpop.f32.mrb[34].mxu0 }
 0x553   : > { %v1744_v19 = vpop.f32.mrb[35].mxu0  ;;  %2905 = vtanh.f32 %v1742_v42 }
 0x554   : > { %2907 = vtanh.f32 %v1744_v19 }
 0x555   : > { %v2898_v25 = vpop.eup %2897 }
 0x556   : > { %v1748_v24 = vpop.f32.mrb[36].mxu0  ;;  %v2900_v52 = vpop.eup %2899 }
 0x557   : > { %2909 = vtanh.f32 %v1748_v24  ;;  %v1750_v50 = vpop.f32.mrb[37].mxu0 }
 0x558   : > { %2911 = vtanh.f32 %v1750_v50 }
 0x559   : > { %v2902_v5 = vpop.eup %2901 }
 0x55a   : > { %v2904_v6 = vpop.eup %2903  ;;  %v2695_v56 = vpack.c.bf16 %v2902_v5, %v2898_v25  ;;  %v1754_v46 = vpop.f32.mrb[38].mxu0 }
 0x55b   : > { %v2693_v53 = vpack.c.bf16 %v2904_v6, %v2900_v52  ;;  %v1756_v55 = vpop.f32.mrb[39].mxu0 }
 0x55c   : > { %2913 = vtanh.f32 %v1756_v55 }
 0x55d   : > { %2694 = vmatprep.subr.bf16.mxu1 %v2693_v53  ;;  %v2906_v57 = vpop.eup %2905  ;;  %2915 = vtanh.f32 %v1754_v46 }
 0x55e   : > { %2696 = vmatpush1.bf16.xpose.msra.mxu1 %v2695_v56  ;;  %v2908_v60 = vpop.eup %2907 }
 0x561   : > { %v2910_v62 = vpop.eup %2909 }
 0x562   : > { %v2912_v63 = vpop.eup %2911  ;;  %v2699_v3 = vpack.c.bf16 %v2910_v62, %v2906_v57 }
 0x563   : > { %v2697_v4 = vpack.c.bf16 %v2912_v63, %v2908_v60 }
 0x565   : > { %2698 = vmatprep.subr.bf16.mxu1 %v2697_v4  ;;  %v1981_v4 = vpop.permute.xlu0 %1980 }
 0x566   : > { %v2914_v40 = vpop.eup %2913  ;;  %2700 = vmatpush1.bf16.xpose.msra.mxu1 %v2699_v3 }
 0x567   : > { %1801 = vmatprep.subr.mxu1 %v2914_v40  ;;  %v2916_v9 = vpop.eup %2915 }
 0x56e   : > { %1802 = vmatpush1.xpose.msra.mxu1 %v2916_v9 }
 0x571   : > { %1858 = vmatmul.mubr.f32.vlgmr.msra.gmra.mrb[34].mxu1 %v1786_v12 }
 0x572   : > { %1862 = vmatprep.mubr.f32.mxu1 %v1790_v11 }
 0x575   : > { %1863 = vmatmul.mubr.f32.gmra.mrb[36].mxu1 %v1786_v12 }
 0x576   : > { %1867 = vmatprep.mubr.f32.mxu1 %v1790_v11 }
 0x579   : > { %1868 = vmatmul.mubr.f32.gmra.mrb[38].mxu1 %v1786_v12 }
 0x57a   : > { %1872 = vmatprep.mubr.f32.mxu1 %v1790_v11 }
 0x57d   : > { %1873 = vmatmul.mubr.f32.gmra.mrb[40].mxu1 %v1786_v12 }
 0x57e   : > { %1877 = vmatprep.mubr.f32.mxu1 %v1790_v11 }
 0x581   : > { %1878 = vmatmul.mubr.f32.gmra.mrb[42].mxu1 %v1786_v12 }
 0x582   : > { %2129 = vmatprep.mubr.f32.mxu1 %v3264_v61 }
 0x5e0   : > { %v1561_v16 = vpop.f32.mrb[24].mxu1 }
 0x5e1   : > { %v1562_v20 = vadd.f32 %v1561_v16, %v1488_v15  ;;  %v1563_v34 = vpop.f32.mrb[25].mxu1 }
 0x5e2   : > { %v1564_v35 = vadd.f32 %v1563_v34, %v1492_v44 }
 0x5e4   : > { %2917 = vtanh.f32 %v1564_v35  ;;  %v1567_v36 = vpop.f32.mrb[26].mxu1 }
 0x5e5   : > { %2919 = vtanh.f32 %v1562_v20  ;;  %v1568_v37 = vadd.f32 %v1567_v36, %v1488_v15  ;;  %v1569_v38 = vpop.f32.mrb[27].mxu1 }
 0x5e6   : > { %v1570_v39 = vadd.f32 %v1569_v38, %v1492_v44 }
 0x5e8   : > { %2921 = vtanh.f32 %v1570_v39  ;;  %v1573_v21 = vpop.f32.mrb[28].mxu1 }
 0x5e9   : > { %2923 = vtanh.f32 %v1568_v37  ;;  %v1574_v43 = vadd.f32 %v1573_v21, %v1488_v15  ;;  %v1575_v23 = vpop.f32.mrb[29].mxu1 }
 0x5ea   : > { %v1576_v45 = vadd.f32 %v1575_v23, %v1492_v44 }
 0x5ec   : > { %2925 = vtanh.f32 %v1576_v45  ;;  %v1579_v59 = vpop.f32.mrb[30].mxu1 }
 0x5ed   : > { %2927 = vtanh.f32 %v1574_v43  ;;  %v1580_v58 = vadd.f32 %v1579_v59, %v1488_v15  ;;  %v1581_v49 = vpop.f32.mrb[31].mxu1 }
 0x5ee   : > { %v2918_v51 = vpop.eup %2917  ;;  %v1582_v41 = vadd.f32 %v1581_v49, %v1492_v44 }
 0x5ef   : > { %v2920_v47 = vpop.eup %2919  ;;  %1947 = vmatprep.mubr.f32.mxu0 %v2918_v51 }
 0x5f0   : > { %2929 = vtanh.f32 %v1582_v41  ;;  %v1585_v54 = vpop.f32.mrb[32].mxu1  ;;  %1948 = vmatmul.mubr.f32.vlgmr.msra.gmra.mrb[40].mxu0 %v2920_v47 }
 0x5f1   : > { %2931 = vtanh.f32 %v1580_v58  ;;  %v1586_v0 = vadd.f32 %v1585_v54, %v1488_v15  ;;  %v1587_v1 = vpop.f32.mrb[33].mxu1 }
 0x5f2   : > { %v2922_v7 = vpop.eup %2921  ;;  %v1588_v8 = vadd.f32 %v1587_v1, %v1492_v44  ;;  %v2709_v1 = vpack.c.bf16 %v3864_v27, %v3856_v26 }
 0x5f3   : > { %v2924_v14 = vpop.eup %2923  ;;  %1952 = vmatprep.mubr.f32.mxu0 %v2922_v7 }
 0x5f4   : > { %2933 = vtanh.f32 %v1588_v8  ;;  %1953 = vmatmul.mubr.f32.gmra.mrb[42].mxu0 %v2924_v14  ;;  %2710 = vmatprep.subr.bf16.mxu1 %v2709_v1 }
 0x5f5   : > { %2935 = vtanh.f32 %v1586_v0  ;;  %v2711_v0 = vpack.c.bf16 %v3868_v28, %v3860_v22 }
 0x5f6   : > { %v2926_v17 = vpop.eup %2925 }
 0x5f7   : > { %v2928_v18 = vpop.eup %2927  ;;  %1957 = vmatprep.mubr.f32.mxu0 %v2926_v17  ;;  %2712 = vmatpush1.bf16.msra.mxu1 %v2711_v0 }
 0x5f8   : > { %1958 = vmatmul.mubr.f32.gmra.mrb[44].mxu0 %v2928_v18 }
 0x5fa   : > { %v2930_v42 = vpop.eup %2929 }
 0x5fb   : > { %v2932_v19 = vpop.eup %2931  ;;  %1962 = vmatprep.mubr.f32.mxu0 %v2930_v42 }
 0x5fc   : > { %1963 = vmatmul.mubr.f32.gmra.mrb[46].mxu0 %v2932_v19 }
 0x5fe   : > { %v2934_v24 = vpop.eup %2933 }
 0x5ff   : > { %v2936_v25 = vpop.eup %2935  ;;  %1967 = vmatprep.mubr.f32.mxu0 %v2934_v24 }
 0x600   : > { %1968 = vmatmul.mubr.f32.gmra.mrb[48].mxu0 %v2936_v25 }
 0x644   : > { %v1859_v50 = vpop.f32.mrb[34].mxu1 }
 0x645   : > { %v1861_v52 = vpop.f32.mrb[35].mxu1 }
 0x648   : > { %v1864_v5 = vpop.f32.mrb[36].mxu1 }
 0x649   : > { %v1866_v6 = vpop.f32.mrb[37].mxu1 }
 0x64c   : > { %v1869_v56 = vpop.f32.mrb[38].mxu1 }
 0x64d   : > { %v1871_v46 = vpop.f32.mrb[39].mxu1 }
 0x650   : > { %v1874_v53 = vpop.f32.mrb[40].mxu1 }
 0x651   : > { %v1876_v55 = vpop.f32.mrb[41].mxu1 }
 0x654   : > { %v1879_v57 = vpop.f32.mrb[42].mxu1 }
 0x655   : > { %v1881_v60 = vpop.f32.mrb[43].mxu1 }
 0x6c3   : > { %v1949_v62 = vpop.f32.mrb[40].mxu0 }
 0x6c4   : > { %v1950_v63 = vadd.f32 %v1949_v62, %v1859_v50  ;;  %v1951_v3 = vpop.f32.mrb[41].mxu0 }
 0x6c5   : > { %v2713_v3 = vpack.c.bf16 %v3880_v48, %v3872_v29 }
 0x6c6   : > { %v1983_v40 = vadd.f32 %v1981_v4, %v1950_v63  ;;  %v2715_v63 = vpack.c.bf16 %v3884_v31, %v3876_v30 }
 0x6c7   : > { %v1954_v9 = vpop.f32.mrb[42].mxu0  ;;  %2714 = vmatprep.subr.bf16.mxu1 %v2713_v3 }
 0x6c8   : > { %v1955_v10 = vadd.f32 %v1954_v9, %v1864_v5  ;;  %v1956_v11 = vpop.f32.mrb[43].mxu0  ;;  %v1989_v12 = vsel %vm1988_vm2, %v1983_v40, -1e+30  ;;  %2716 = vmatpush1.bf16.msra.mxu1 %v2715_v63 }
 0x6c9   : > { %v1995_v13 = vsel %vm1994_vm3, %v1989_v12, -inf  ;;  %2073 = vmatprep.subr.mxu1 %v3888_v32 }
 0x6ca   : > { %v1984_v15 = vadd.f32 %v1981_v4, %v1955_v10  ;;  %1996 = vmax.xlane.f32.xlu1 %v1995_v13 }
 0x6cb   : > { %v1959_v44 = vpop.f32.mrb[44].mxu0 }
 0x6cc   : > { %v1960_v16 = vadd.f32 %v1959_v44, %v1869_v56  ;;  %v1961_v20 = vpop.f32.mrb[45].mxu0  ;;  %v1990_v34 = vsel %vm1988_vm2, %v1984_v15, -1e+30  ;;  %2074 = vmatpush1.msra.mxu1 %v3892_v33 }
 0x6cd   : > { %v1998_v35 = vsel %vm1994_vm3, %v1990_v34, -inf }
 0x6ce   : > { %v1985_v36 = vadd.f32 %v1981_v4, %v1960_v16  ;;  %1999 = vmax.xlane.f32.xlu1 %v1998_v35 }
 0x6cf   : > { %v1964_v37 = vpop.f32.mrb[46].mxu0 }
 0x6d0   : > { %v1965_v38 = vadd.f32 %v1964_v37, %v1874_v53  ;;  %v1966_v39 = vpop.f32.mrb[47].mxu0  ;;  %v1991_v21 = vsel %vm1988_vm2, %v1985_v36, -1e+30 }
 0x6d1   : > { %v2001_v43 = vsel %vm1994_vm3, %v1991_v21, -inf }
 0x6d2   : > { %v1986_v23 = vadd.f32 %v1981_v4, %v1965_v38  ;;  %2002 = vmax.xlane.f32.xlu1 %v2001_v43 }
 0x6d3   : > { %v1969_v45 = vpop.f32.mrb[48].mxu0 }
 0x6d4   : > { %v1970_v59 = vadd.f32 %v1969_v45, %v1879_v57  ;;  %v1971_v58 = vpop.f32.mrb[49].mxu0  ;;  %v1992_v49 = vsel %vm1988_vm2, %v1986_v23, -1e+30 }
 0x6d5   : > { %v2004_v51 = vsel %vm1994_vm3, %v1992_v49, -inf }
 0x6d6   : > { %v1987_v41 = vadd.f32 %v1981_v4, %v1970_v59  ;;  %2005 = vmax.xlane.f32.xlu1 %v2004_v51 }
 0x6d8   : > { %v1993_v47 = vsel %vm1988_vm2, %v1987_v41, -1e+30 }
 0x6d9   : > { %v2007_v54 = vsel %vm1994_vm3, %v1993_v47, -inf }
 0x6da   : > { %2008 = vmax.xlane.f32.xlu1 %v2007_v54 }
 0x757   : > { %v1997_v7 = vpop.xlane.xlu1 %1996 }
 0x758   : > { %v2010_v8 = vsub.f32 %v1989_v12, %v1997_v7 }
 0x75a   : > { %v2015_v14 = vmul.f32 1.442695, %v2010_v8 }
 0x75b   : > { %v2000_v17 = vpop.xlane.xlu1 %1999 }
 0x75c   : > { %2937 = vpow2.f32 %v2015_v14  ;;  %v2011_v18 = vsub.f32 %v1990_v34, %v2000_v17 }
 0x75e   : > { %v2017_v42 = vmul.f32 1.442695, %v2011_v18 }
 0x75f   : > { %v2003_v2 = vpop.xlane.xlu1 %2002 }
 0x760   : > { %2939 = vpow2.f32 %v2017_v42  ;;  %v2012_v19 = vsub.f32 %v1991_v21, %v2003_v2 }
 0x762   : > { %v2019_v24 = vmul.f32 1.442695, %v2012_v19 }
 0x763   : > { %v2006_v25 = vpop.xlane.xlu1 %2005 }
 0x764   : > { %2941 = vpow2.f32 %v2019_v24  ;;  %v2013_v50 = vsub.f32 %v1992_v49, %v2006_v25 }
 0x766   : > { %v2938_v22 = vpop.eup %2937  ;;  %v2021_v28 = vmul.f32 1.442695, %v2013_v50 }
 0x767   : > { %v2009_v52 = vpop.xlane.xlu1 %2008  ;;  %v2025_v26 = vsel %vm1994_vm3, %v2938_v22, 0.0 }
 0x768   : > { %2943 = vpow2.f32 %v2021_v28  ;;  %v2014_v27 = vsub.f32 %v1993_v47, %v2009_v52  ;;  %2026 = vadd.xlane.f32.xlu1 %v2025_v26 }
 0x76a   : > { %v2940_v5 = vpop.eup %2939  ;;  %v2023_v6 = vmul.f32 1.442695, %v2014_v27 }
 0x76b   : > { %v2028_v56 = vsel %vm1994_vm3, %v2940_v5, 0.0 }
 0x76c   : > { %2945 = vpow2.f32 %v2023_v6  ;;  %2029 = vadd.xlane.f32.xlu0 %v2028_v56 }
 0x76e   : > { %v2942_v46 = vpop.eup %2941 }
 0x76f   : > { %v2031_v53 = vsel %vm1994_vm3, %v2942_v46, 0.0 }
 0x770   : > { %2032 = vadd.xlane.f32.xlu1 %v2031_v53 }
 0x772   : > { %v2944_v55 = vpop.eup %2943 }
 0x773   : > { %v2034_v57 = vsel %vm1994_vm3, %v2944_v55, 0.0 }
 0x774   : > { %2035 = vadd.xlane.f32.xlu1 %v2034_v57 }
 0x776   : > { %v2946_v60 = vpop.eup %2945 }
 0x777   : > { %v2037_v62 = vsel %vm1994_vm3, %v2946_v60, 0.0 }
 0x778   : > { %2038 = vadd.xlane.f32.xlu1 %v2037_v62 }
 0x7f5   : > { %v2027_v4 = vpop.xlane.xlu1 %2026 }
 0x7f6   : > { %2947 = vrcp.f32 %v2027_v4 }
 0x7f9   : > { %v2030_v40 = vpop.xlane.xlu0 %2029 }
 0x7fa   : > { %2949 = vrcp.f32 %v2030_v40 }
 0x7fd   : > { %v2033_v9 = vpop.xlane.xlu1 %2032 }
 0x7fe   : > { %2951 = vrcp.f32 %v2033_v9 }
 0x800   : > { %v2948_v10 = vpop.eup %2947 }
 0x801   : > { %v2041_v11 = vmul.f32 %v2948_v10, %v2938_v22  ;;  %v2036_v12 = vpop.xlane.xlu1 %2035 }
 0x802   : > { %2953 = vrcp.f32 %v2036_v12 }
 0x803   : > { %2392 = vmatmul.mubr.msk.f32.vlgmr.msra.gmra.mrb[44].mxu1 %vm1994_vm3, %v2041_v11 }
 0x804   : > { %v2950_v30 = vpop.eup %2949  ;;  %2135 = vmatprep.mubr.f32.mxu1 %v3264_v61 }
 0x805   : > { %v2039_v29 = vpop.xlane.xlu1 %2038  ;;  %v2043_v48 = vmul.f32 %v2950_v30, %v2940_v5 }
 0x806   : > { %2955 = vrcp.f32 %v2039_v29 }
 0x807   : > { %2393 = vmatmul.mubr.msk.f32.gmra.mrb[46].mxu1 %vm1994_vm3, %v2043_v48 }
 0x808   : > { %v2952_v31 = vpop.eup %2951  ;;  %2141 = vmatprep.mubr.f32.mxu1 %v3264_v61 }
 0x809   : > { %v2045_v32 = vmul.f32 %v2952_v31, %v2942_v46 }
 0x80b   : > { %2394 = vmatmul.mubr.msk.f32.gmra.mrb[48].mxu1 %vm1994_vm3, %v2045_v32 }
 0x80c   : > { %v2954_v33 = vpop.eup %2953  ;;  %2147 = vmatprep.mubr.f32.mxu1 %v3264_v61 }
 0x80d   : > { %v2047_v13 = vmul.f32 %v2954_v33, %v2944_v55 }
 0x80f   : > { %2395 = vmatmul.mubr.msk.f32.gmra.mrb[50].mxu1 %vm1994_vm3, %v2047_v13 }
 0x810   : > { %v2956_v15 = vpop.eup %2955  ;;  %2153 = vmatprep.mubr.f32.mxu1 %v3264_v61 }
 0x811   : > { %v2049_v44 = vmul.f32 %v2956_v15, %v2946_v60 }
 0x813   : > { %2396 = vmatmul.mubr.msk.f32.gmra.mrb[52].mxu1 %vm1994_vm3, %v2049_v44 }
 0x814   : > { %3152 = shalt.err (!%p3149_p8)
}
 0x815   : > { %s3153_s10 = scalar_lea.hbm %s3973_s16, 1280  ;;  %s3157_s0 = scalar_lea.hbm %s4121_s18, 2560 }
 0x816   : > { %p3154_p11 = scmp.ne.s32.totalorder %s3973_s16, %s3153_s10  ;;  %p3158_p1 = scmp.lt.u32.totalorder %s3973_s16, %s4121_s18 }
 0x817   : > { %p3159_p2 = scmp.lt.u32.totalorder %s3157_s0, %s3153_s10  ;;  %p3161_p0 = scmp.lt.u32.totalorder %s3153_s10, %s3973_s16 }
 0x818   : > { %p3155_p7 = pnand %p3154_p11, %p3526_p10 }
 0x819   : > { %p3160_p13 = por %p3159_p2, %p3158_p1 }
 0x81a   : > { %p3156_p12 = pneg %p3155_p7 }
 0x81b   : > { %p3162_p4 = por %p3161_p0, %p3160_p13 }
 0x81d   : > { %p3163_p6 = pnand %p3162_p4, %p3156_p12 }
 0x81f   : > { %3166 = shalt.err (!%p3163_p6)
}
 0x820   : > { %s3266_s22 = smov 256   ;;  %s3267_s30 = smov 16  }
 0x821   : > { %2746 = dma.vmem_to_hbm [thread:$0]  (%p3526_p10), %s3966_s27, 1280, %s3973_s16, %s2176_s11, %s3266_s22, %s3266_s22, %s3267_s30  }
 0x822   : > { %s618_s20 = scalar_lea.vmem [#allocation15], %s3628_s21  ;;  %s4122_s16 = sld [smem:[#allocation34_spill]] }
 0x823   : > { %s2189_s2 = sshll.u32 %s618_s20, 4  ;;  %s2171_s17 = scalar_lea.sflag [#allocation6], %s3625_s8  ;;  %s4003_s2 = int_to_ptr.vmem [resolvable:$true] %s2189_s2 }
 0x824   : > { %s3167_s12 = scalar_lea.vmem %s4003_s2, 1280  ;;  %s3268_s10 = smov [#allocation15]  }
 0x825   : > { %p3168_p3 = scmp.ne.s32.totalorder %s4003_s2, %s3167_s12  ;;  %s3171_s19 = sshll.u32 %s3268_s10, 4  ;;  %s3172_s19 = int_to_ptr.vmem [resolvable:$false] %s3171_s19 }
 0x826   : > { %s3173_s29 = scalar_lea.vmem %s3172_s19, 2560  ;;  %p3174_p8 = scmp.lt.s32.totalorder %s4003_s2, %s3172_s19 }
 0x827   : > { %p3169_p5 = pnand %p3168_p3, %p3526_p10  ;;  %p3175_p11 = scmp.lt.s32.totalorder %s3173_s29, %s3167_s12 }
 0x828   : > { %s4010_s11 = scalar_lea.hbm %s4122_s16, %s2723_s26 }
 0x829   : > { %p3170_p9 = pneg %p3169_p5  ;;  %p3176_p7 = por %p3175_p11, %p3174_p8 }
 0x82b   : > { %p3177_p12 = pnand %p3176_p7, %p3170_p9 }
 0x8d6   : > { %v2131_v61 = vpop.f32.mrb[44].mxu1 }
 0x8d7   : > { %2160 = vst [vmem:[%s618_s20] sm:$0xff] %v2131_v61  ;;  %v2133_v16 = vpop.f32.mrb[45].mxu1 }
 0x8d8   : > { %2161 = vst [vmem:[%s618_s20 + $0x8] sm:$0xff] %v2133_v16 }
 0x8da   : > { %v2137_v20 = vpop.f32.mrb[46].mxu1 }
 0x8db   : > { %2162 = vst [vmem:[%s618_s20 + $0x10] sm:$0xff] %v2137_v20  ;;  %v2139_v34 = vpop.f32.mrb[47].mxu1 }
 0x8dc   : > { %2163 = vst [vmem:[%s618_s20 + $0x18] sm:$0xff] %v2139_v34 }
 0x8de   : > { %v2143_v35 = vpop.f32.mrb[48].mxu1 }
 0x8df   : > { %2164 = vst [vmem:[%s618_s20 + $0x20] sm:$0xff] %v2143_v35  ;;  %v2145_v36 = vpop.f32.mrb[49].mxu1 }
 0x8e0   : > { %2165 = vst [vmem:[%s618_s20 + $0x28] sm:$0xff] %v2145_v36 }
 0x8e2   : > { %v2149_v37 = vpop.f32.mrb[50].mxu1 }
 0x8e3   : > { %2166 = vst [vmem:[%s618_s20 + $0x30] sm:$0xff] %v2149_v37  ;;  %v2151_v38 = vpop.f32.mrb[51].mxu1 }
 0x8e4   : > { %2167 = vst [vmem:[%s618_s20 + $0x38] sm:$0xff] %v2151_v38 }
 0x8e6   : > { %v2155_v39 = vpop.f32.mrb[52].mxu1 }
 0x8e7   : > { %2168 = vst [vmem:[%s618_s20 + $0x40] sm:$0xff] %v2155_v39  ;;  %v2157_v21 = vpop.f32.mrb[53].mxu1 }
 0x8e8   : > { %2169 = vst [vmem:[%s618_s20 + $0x48] sm:$0xff] %v2157_v21 }
 0x8e9   : > { %3180 = shalt.err (!%p3177_p12)
}
 0x8ea   : > { %s3181_s13 = scalar_lea.hbm %s4010_s11, 1280  ;;  %s3185_s4 = scalar_lea.hbm %s4122_s16, 2560 }
 0x8eb   : > { %p3182_p1 = scmp.ne.s32.totalorder %s4010_s11, %s3181_s13  ;;  %p3186_p0 = scmp.lt.u32.totalorder %s4010_s11, %s4122_s16 }
 0x8ec   : > { %p3187_p4 = scmp.lt.u32.totalorder %s3185_s4, %s3181_s13  ;;  %p3189_p3 = scmp.lt.u32.totalorder %s3181_s13, %s4010_s11 }
 0x8ed   : > { %p3183_p2 = pnand %p3182_p1, %p3526_p10 }
 0x8ee   : > { %p3188_p6 = por %p3187_p4, %p3186_p0 }
 0x8ef   : > { %p3184_p13 = pneg %p3183_p2 }
 0x8f0   : > { %p3190_p5 = por %p3189_p3, %p3188_p6 }
 0x8f2   : > { %p3191_p9 = pnand %p3190_p5, %p3184_p13 }
 0x8f4   : > { %3194 = shalt.err (!%p3191_p9)
}
 0x8f5   : > { %2745 = dma.vmem_to_hbm [thread:$0]  (%p3526_p10), %s4003_s2, 1280, %s4010_s11, %s2171_s17, %s3266_s22, %s3266_s22, %s3267_s30  }
 0x8f6 PF: > { %s4123_s21 = sld [smem:[#allocation25_spill]]  ;;  %s4124_s27 = sld [smem:[#allocation26_spill]] }
 0x8f7   : > { %p4126_p11 = scmp.ge.s32.totalorder %s3253_s24, 2 }
 0x8fc   : > { %s2220_s12 = sand.u32 1, %s4123_s21   ;;  %p4125_p8 = scmp.ne.s32.totalorder %s4124_s27, 0 }
 0x8fd   : > { %s2221_s10 = scalar_lea.sflag [#allocation6], %s2220_s12 }
 0x8fe   : > { %p2770_p7 = pnand %p4126_p11, %p4125_p8 }
 0x900   : > { %3232 = dma.done.wait (!%p2770_p7), %s2221_s10, 1280  }
 0x901   : > { %3234 = vsyncadd (!%p2770_p7), %s2221_s10, 4294966016  ;;  %s2230_s15 = scalar_lea.sflag [#allocation17], %s2220_s12 }
 0x902   : > { %3236 = dma.done.wait (!%p2770_p7), %s2230_s15, 1280  }
 0x903   : > { %3238 = vsyncadd (!%p2770_p7), %s2230_s15, 4294966016  ;;  %p41_p10 = scmp.ge.s32.totalorder %s3516_s14, 4   ;;  %s4127_s22 = smov %s3245_s23 }
 0x904   : > { %s4128_s23 = smov %s3249_s7  ;;  %s4129_s7 = smov %s3532_s25 }
 0x905   : > { %s4130_s24 = smov %s3516_s14  ;;  %43 = sbr.rel (!%p41_p10) target bundleno = 21 (0x15), region = 167 }
 0x90c   :  { %2235 = vsyncpa [#allocation5], 1 }
 0x90d   :  { %2237 = vsyncpa [#allocation5 + $0x1], 1 }
 0x90e   :  { %2238 = vsyncpa [#allocation8], 1 }
 0x90f   :  { %2240 = vsyncpa [#allocation8 + $0x1], 1 }
 0x910   :  { %2241 = vsyncpa [#allocation11], 1 }
 0x911   :  { %2242 = vsyncpa [#allocation14], 1 }
 0x912   :  { %2243 = vsyncpa [#allocation6], 1 }
 0x913   :  { %2245 = vsyncpa [#allocation6 + $0x1], 1 }
 0x914   :  { %2246 = vsyncpa [#allocation17], 1 }
 0x915   :  { %2248 = vsyncpa [#allocation17 + $0x1], 1 }

</bundles_post_ra>
